<compile_context>
chip_gen: v7x
topology: tpu7x:2x2x1
jax: 0.10.0
libtpu: 0.0.40
codegen_flags: <defaults>
</compile_context>

<pallas_src>
import functools

import jax
import jax.numpy as jnp
from jax import lax
from jax.experimental import pallas as pl
from jax.experimental.pallas import tpu as pltpu


def _round_up(a, b):
    return -(-a // b) * b


def _single_stage_kernel(x_hbm, m_hbm, w_in_ref, b_in_ref, w1_ref, b1_ref,
                         w2_ref, b2_ref, w_out_ref, b_out_ref, out_ref,
                         xbuf, mbuf, sem, *, dilations, tile_t, halo, wfetch,
                         seq_len):
    """One (batch element, time tile) per grid step.

    x_hbm  : (N, Cin, L_pad)  zero-padded input, raw HBM ref
    m_hbm  : (N, 1,   L_pad)  zero-padded mask channel 0, raw HBM ref
    w_in   : (C, Cin), b_in: (C, 1)
    w1     : (L, C, 3C)  dilated-conv weights, 3 taps fused along K
    b1     : (L, C, 1)
    w2     : (L, C, C),  b2: (L, C, 1)
    w_out  : (K, C),     b_out: (K, 1)
    out    : (1, K, tile_t)
    xbuf   : (2, Cin, wfetch)  double-buffered x window (lane-aligned fetch)
    mbuf   : (2, 1,   wfetch)  double-buffered mask window
    sem    : DMA semaphores (2, 2)
    """
    n = pl.program_id(0)
    t = pl.program_id(1)
    num_t = pl.num_programs(1)
    wx = tile_t + 2 * halo          # columns actually needed for this tile

    def dma(tt, slot):
        off = pl.multiple_of(tt * tile_t, tile_t)
        return (
            pltpu.make_async_copy(x_hbm.at[n, :, pl.ds(off, wfetch)],
                                  xbuf.at[slot], sem.at[0, slot]),
            pltpu.make_async_copy(m_hbm.at[n, :, pl.ds(off, wfetch)],
                                  mbuf.at[slot], sem.at[1, slot]),
        )

    slot = t & 1

    # Prime the first tile of this batch row.
    @pl.when(t == 0)
    def _():
        for cp in dma(t, slot):
            cp.start()

    # Prefetch the next tile into the other slot (hides HBM DMA latency).
    @pl.when(t + 1 < num_t)
    def _():
        for cp in dma(t + 1, (t + 1) & 1):
            cp.start()

    # Wait for the current tile.
    for cp in dma(t, slot):
        cp.wait()

    x_win = xbuf[slot][:, :wx]      # (Cin, wx) f32
    m_ext = mbuf[slot][:, :wx]      # (1,  wx) f32, zero outside [0, T)

    # Positions of the window in padded coordinates; valid == 1 only inside
    # the real sequence [0, T).  Needed because the input 1x1 conv adds a bias
    # that must be zeroed where Conv1d zero padding would supply zeros.
    pos = lax.broadcasted_iota(jnp.int32, (1, wx), 1) + t * tile_t
    valid = jnp.logical_and(pos >= halo, pos < halo + seq_len).astype(jnp.float32)

    # Input 1x1 conv (channel matmul on the MXU).
    h = jnp.dot(w_in_ref[...], x_win, preferred_element_type=jnp.float32)
    h = (h + b_in_ref[...]) * valid                       # (C, wx)

    # Dilated residual layers; the halo shrinks by the dilation each layer.
    rem = halo
    for l, d in enumerate(dilations):
        rem -= d
        out_w = tile_t + 2 * rem
        tap0 = h[:, 0:out_w]
        tap1 = h[:, d:d + out_w]                          # also the residual
        tap2 = h[:, 2 * d:2 * d + out_w]
        stacked = jnp.concatenate([tap0, tap1, tap2], axis=0)   # (3C, out_w)
        c = jnp.dot(w1_ref[l], stacked, preferred_element_type=jnp.float32)
        c = jnp.maximum(c + b1_ref[l], 0.0)               # ReLU
        y = jnp.dot(w2_ref[l], c, preferred_element_type=jnp.float32) + b2_ref[l]
        m_l = m_ext[:, halo - rem:halo - rem + out_w]
        h = (tap1 + y) * m_l                              # (C, out_w)
        # TODO(synk): nn.Dropout() is identity here (eval mode).

    # Output 1x1 conv * mask; h now has width exactly tile_t.
    logits = jnp.dot(w_out_ref[...], h,
                     preferred_element_type=jnp.float32) + b_out_ref[...]
    out_ref[0] = (logits * m_ext[:, halo:halo + tile_t]).astype(out_ref.dtype)


def mstcn_single_stage(x, mask, w_in, b_in, layer_w1, layer_b1, layer_w2,
                       layer_b2, w_out, b_out, *, tile_t=128):
    """Fused _SingleStageModel forward.

    x: (N, dim, T), mask: (N, Cm, T) (only channel 0 used).
    w_in: (C, dim[, 1]), b_in: (C,)
    layer_w1[l]: (C, C, 3), layer_b1[l]: (C,)   (conv_dilated, dilation 2^l)
    layer_w2[l]: (C, C[, 1]), layer_b2[l]: (C,) (conv_1x1)
    w_out: (K, C[, 1]), b_out: (K,)
    """
    assert tile_t % 128 == 0, "tile_t must be a multiple of 128 (lane-dense)"

    def _squeeze_k1(w):
        return w[..., 0] if w.ndim == 3 and w.shape[-1] == 1 else w

    w_in = _squeeze_k1(w_in)
    w_out = _squeeze_k1(w_out)
    layer_w2 = [_squeeze_k1(w) for w in layer_w2]

    N, dim, T = x.shape
    C = w_in.shape[0]
    K = w_out.shape[0]
    L = len(layer_w1)
    dilations = tuple(2 ** i for i in range(L))
    halo = sum(dilations)
    num_t = -(-T // tile_t)
    T_pad = num_t * tile_t
    wx = tile_t + 2 * halo
    wfetch = _round_up(wx, 128)              # lane-aligned DMA window
    L_pad = T_pad - tile_t + wfetch          # padded length covers last fetch
    f32 = jnp.float32

    # Glue: stack per-layer weights; fuse the 3 taps along K -> (C, 3C).
    w1_stack = jnp.stack([jnp.transpose(w, (0, 2, 1)).reshape(C, 3 * C)
                          for w in layer_w1]).astype(f32)          # (L, C, 3C)
    b1_stack = jnp.stack([b.reshape(C, 1) for b in layer_b1]).astype(f32)
    w2_stack = jnp.stack(layer_w2).astype(f32)                     # (L, C, C)
    b2_stack = jnp.stack([b.reshape(C, 1) for b in layer_b2]).astype(f32)
    w_in_m = w_in.astype(f32)
    b_in_c = b_in.reshape(C, 1).astype(f32)
    w_out_m = w_out.astype(f32)
    b_out_c = b_out.reshape(K, 1).astype(f32)

    # One-time halo + round-up zero padding of the raw input and the single
    # mask channel (the only activation-sized copies in the fused stage).
    x_pad = jnp.pad(x.astype(f32), ((0, 0), (0, 0), (halo, L_pad - halo - T)))
    m_pad = jnp.pad(mask[:, 0:1, :].astype(f32),
                    ((0, 0), (0, 0), (halo, L_pad - halo - T)))

    kernel = functools.partial(_single_stage_kernel, dilations=dilations,
                               tile_t=tile_t, halo=halo, wfetch=wfetch,
                               seq_len=T)

    out = pl.pallas_call(
        kernel,
        out_shape=jax.ShapeDtypeStruct((N, K, T_pad), jnp.float32),
        grid_spec=pltpu.PrefetchScalarGridSpec(
            num_scalar_prefetch=0,
            grid=(N, num_t),
            in_specs=[
                pl.BlockSpec(memory_space=pl.ANY),                    # x (HBM)
                pl.BlockSpec(memory_space=pl.ANY),                    # mask (HBM)
                pl.BlockSpec((C, dim), lambda n, t: (0, 0)),          # w_in
                pl.BlockSpec((C, 1), lambda n, t: (0, 0)),            # b_in
                pl.BlockSpec((L, C, 3 * C), lambda n, t: (0, 0, 0)),  # w1
                pl.BlockSpec((L, C, 1), lambda n, t: (0, 0, 0)),      # b1
                pl.BlockSpec((L, C, C), lambda n, t: (0, 0, 0)),      # w2
                pl.BlockSpec((L, C, 1), lambda n, t: (0, 0, 0)),      # b2
                pl.BlockSpec((K, C), lambda n, t: (0, 0)),            # w_out
                pl.BlockSpec((K, 1), lambda n, t: (0, 0)),            # b_out
            ],
            out_specs=pl.BlockSpec((1, K, tile_t), lambda n, t: (n, 0, t)),
            scratch_shapes=[
                pltpu.VMEM((2, dim, wfetch), jnp.float32),   # x double buffer
                pltpu.VMEM((2, 1, wfetch), jnp.float32),     # mask double buffer
                pltpu.SemaphoreType.DMA((2, 2)),
            ],
        ),
        compiler_params=pltpu.CompilerParams(
            # N parallel (core sharding on multi-TC chips); T sequential
            # because of the manual cross-step prefetch chain along time.
            dimension_semantics=("parallel", "arbitrary"),
            vmem_limit_bytes=32 * 1024 * 1024,
        ),
    )(x_pad, m_pad, w_in_m, b_in_c, w1_stack, b1_stack, w2_stack, b2_stack,
      w_out_m, b_out_c)
    return out[:, :, :T]


def _reference(x, mask, w_in, b_in, layer_w1, layer_b1, layer_w2, layer_b2,
               w_out, b_out):
    """Pure-JAX reference matching PyTorch _SingleStageModel (eval mode)."""
    def _sq(w):
        return w[..., 0] if w.ndim == 3 and w.shape[-1] == 1 else w

    m = mask[:, 0:1, :]
    T = x.shape[-1]
    h = jnp.einsum('oi,nit->not', _sq(w_in), x) + b_in.reshape(1, -1, 1)
    for l, (w1, b1, w2, b2) in enumerate(zip(layer_w1, layer_b1,
                                             layer_w2, layer_b2)):
        d = 2 ** l
        hp = jnp.pad(h, ((0, 0), (0, 0), (d, d)))
        c = b1.reshape(1, -1, 1)
        for k in range(3):
            c = c + jnp.einsum('oi,nit->not', w1[:, :, k],
                               hp[:, :, k * d:k * d + T])
        c = jnp.maximum(c, 0.0)
        y = jnp.einsum('oi,nit->not', _sq(w2), c) + b2.reshape(1, -1, 1)
        h = (h + y) * m
    out = jnp.einsum('oi,nit->not', _sq(w_out), h) + b_out.reshape(1, -1, 1)
    return out * m


if __name__ == "__main__":
    # Small, MS-TCN-consistent shapes: batch=2, feature dim=48, f_maps=32,
    # classes=16, 4 layers (dilations 1,2,4,8 -> halo 15), T=300, TILE_T=128
    # (-> 3 time tiles, exercises halo + partial last tile).
    N, dim, T = 2, 48, 300
    num_layers, num_f_maps, num_classes = 4, 32, 16
    tile_t = 128

    key = jax.random.PRNGKey(0)
    keys = iter(jax.random.split(key, 3 + 4 * num_layers + 2))

    def uniform(k, shape, bound):
        return jax.random.uniform(k, shape, jnp.float32, -bound, bound)

    x = jax.random.normal(next(keys), (N, dim, T), dtype=jnp.float32)

    # Padding mask: sequence 0 full length, sequence 1 valid up to frame 220.
    lengths = jnp.array([T, 220], dtype=jnp.int32)
    mask = (jnp.arange(T)[None, :] < lengths[:, None]).astype(jnp.float32)
    mask = jnp.broadcast_to(mask[:, None, :], (N, num_classes, T))

    bound_in = 1.0 / (dim ** 0.5)
    bound_d = 1.0 / ((3 * num_f_maps) ** 0.5)
    bound_1 = 1.0 / (num_f_maps ** 0.5)

    w_in = uniform(next(keys), (num_f_maps, dim), bound_in)
    b_in = uniform(next(keys), (num_f_maps,), bound_in)

    layer_w1, layer_b1, layer_w2, layer_b2 = [], [], [], []
    for _ in range(num_layers):
        layer_w1.append(uniform(next(keys), (num_f_maps, num_f_maps, 3), bound_d))
        layer_b1.append(uniform(next(keys), (num_f_maps,), bound_d))
        layer_w2.append(uniform(next(keys), (num_f_maps, num_f_maps), bound_1))
        layer_b2.append(uniform(next(keys), (num_f_maps,), bound_1))

    w_out = uniform(next(keys), (num_classes, num_f_maps), bound_1)
    b_out = uniform(next(keys), (num_classes,), bound_1)

    out = mstcn_single_stage(x, mask, w_in, b_in, layer_w1, layer_b1,
                             layer_w2, layer_b2, w_out, b_out, tile_t=tile_t)
    out = jax.block_until_ready(out)

    ref = _reference(x, mask, w_in, b_in, layer_w1, layer_b1,
                     layer_w2, layer_b2, w_out, b_out)

    assert out.shape == (N, num_classes, T)
    assert jnp.allclose(out, ref, atol=2e-4, rtol=2e-4), (
        "kernel mismatch vs reference, max abs diff = "
        f"{float(jnp.max(jnp.abs(out - ref)))}")

    print("KERNEL_OK")
</pallas_src>

<mosaic_0001>
module attributes {stable_mosaic.version = 11 : i64} {
  func.func @_single_stage_kernel(%arg0: i32, %arg1: i32, %arg2: memref<2x48x512xf32, #tpu.memory_space<any>>, %arg3: memref<2x1x512xf32, #tpu.memory_space<any>>, %arg4: memref<32x48xf32, #tpu.memory_space<vmem>>, %arg5: memref<32x1xf32, #tpu.memory_space<vmem>>, %arg6: memref<4x32x96xf32, #tpu.memory_space<vmem>>, %arg7: memref<4x32x1xf32, #tpu.memory_space<vmem>>, %arg8: memref<4x32x32xf32, #tpu.memory_space<vmem>>, %arg9: memref<4x32x1xf32, #tpu.memory_space<vmem>>, %arg10: memref<16x32xf32, #tpu.memory_space<vmem>>, %arg11: memref<16x1xf32, #tpu.memory_space<vmem>>, %arg12: memref<1x16x128xf32, #tpu.memory_space<vmem>>, %arg13: memref<2x48x256xf32, #tpu.memory_space<vmem>>, %arg14: memref<2x1x256xf32, #tpu.memory_space<vmem>>, %arg15: memref<2x2x!tpu.dma_semaphore, #tpu.memory_space<semaphore_mem>>) attributes {dimension_semantics = [#tpu.dimension_semantics<parallel>, #tpu.dimension_semantics<arbitrary>], iteration_bounds = array<i64: 2, 3>, scalar_prefetch = 0 : i64, scratch_operands = 3 : i64, tpu.core_type = #tpu.core_type<tc>, window_params = [{}, {}, {pipeline_mode = #tpu.pipeline_mode<synchronous>, transform_indices = @transform_2, window_bounds = array<i64: 32, 48>}, {pipeline_mode = #tpu.pipeline_mode<synchronous>, transform_indices = @transform_3, window_bounds = array<i64: 32, 1>}, {pipeline_mode = #tpu.pipeline_mode<synchronous>, transform_indices = @transform_4, window_bounds = array<i64: 4, 32, 96>}, {pipeline_mode = #tpu.pipeline_mode<synchronous>, transform_indices = @transform_5, window_bounds = array<i64: 4, 32, 1>}, {pipeline_mode = #tpu.pipeline_mode<synchronous>, transform_indices = @transform_6, window_bounds = array<i64: 4, 32, 32>}, {pipeline_mode = #tpu.pipeline_mode<synchronous>, transform_indices = @transform_7, window_bounds = array<i64: 4, 32, 1>}, {pipeline_mode = #tpu.pipeline_mode<synchronous>, transform_indices = @transform_8, window_bounds = array<i64: 16, 32>}, {pipeline_mode = #tpu.pipeline_mode<synchronous>, transform_indices = @transform_9, window_bounds = array<i64: 16, 1>}, {transform_indices = @transform_10, window_bounds = array<i64: 1, 16, 128>}]} {
    %c1_i32 = arith.constant 1 : i32
    %0 = arith.andi %arg1, %c1_i32 : i32
    %c0_i32 = arith.constant 0 : i32
    %1 = arith.cmpi eq, %arg1, %c0_i32 : i32
    %2 = arith.extui %1 : i1 to i32
    %c0_i32_0 = arith.constant 0 : i32
    %3 = arith.cmpi ne, %2, %c0_i32_0 : i32
    scf.if %3 {
      %c128_i32_84 = arith.constant 128 : i32
      %155 = arith.muli %arg1, %c128_i32_84 : i32
      %156 = tpu.assume_multiple %155, 128 : i32
      %c0_i32_85 = arith.constant 0 : i32
      %c0_i32_86 = arith.constant 0 : i32
      %157 = tpu.memref_slice %arg2[%arg0, %c0_i32_86, %156] : memref<2x48x512xf32, #tpu.memory_space<any>> -> memref<1x48x256xf32, #tpu.memory_space<any>>
      %158 = tpu.memref_squeeze %157 : memref<1x48x256xf32, #tpu.memory_space<any>> -> memref<48x256xf32, #tpu.memory_space<any>>
      %c0_i32_87 = arith.constant 0 : i32
      %c0_i32_88 = arith.constant 0 : i32
      %159 = tpu.memref_slice %arg13[%0, %c0_i32_87, %c0_i32_88] : memref<2x48x256xf32, #tpu.memory_space<vmem>> -> memref<1x48x256xf32, #tpu.memory_space<vmem>>
      %160 = tpu.memref_squeeze %159 : memref<1x48x256xf32, #tpu.memory_space<vmem>> -> memref<48x256xf32, #tpu.memory_space<vmem>>
      %161 = tpu.memref_slice %arg15[%c0_i32_85, %0] : memref<2x2x!tpu.dma_semaphore, #tpu.memory_space<semaphore_mem>> -> memref<1x1x!tpu.dma_semaphore, #tpu.memory_space<semaphore_mem>>
      %162 = tpu.memref_squeeze %161 : memref<1x1x!tpu.dma_semaphore, #tpu.memory_space<semaphore_mem>> -> memref<!tpu.dma_semaphore, #tpu.memory_space<semaphore_mem>>
      tpu.enqueue_dma source(%158 : memref<48x256xf32, #tpu.memory_space<any>>) target(%160 : memref<48x256xf32, #tpu.memory_space<vmem>>) target_semaphore(%162 : memref<!tpu.dma_semaphore, #tpu.memory_space<semaphore_mem>>)
      %c1_i32_89 = arith.constant 1 : i32
      %c0_i32_90 = arith.constant 0 : i32
      %163 = tpu.memref_slice %arg3[%arg0, %c0_i32_90, %156] : memref<2x1x512xf32, #tpu.memory_space<any>> -> memref<1x1x256xf32, #tpu.memory_space<any>>
      %164 = tpu.memref_squeeze %163 : memref<1x1x256xf32, #tpu.memory_space<any>> -> memref<1x256xf32, #tpu.memory_space<any>>
      %c0_i32_91 = arith.constant 0 : i32
      %c0_i32_92 = arith.constant 0 : i32
      %165 = tpu.memref_slice %arg14[%0, %c0_i32_91, %c0_i32_92] : memref<2x1x256xf32, #tpu.memory_space<vmem>> -> memref<1x1x256xf32, #tpu.memory_space<vmem>>
      %166 = tpu.memref_squeeze %165 : memref<1x1x256xf32, #tpu.memory_space<vmem>> -> memref<1x256xf32, #tpu.memory_space<vmem>>
      %167 = tpu.memref_slice %arg15[%c1_i32_89, %0] : memref<2x2x!tpu.dma_semaphore, #tpu.memory_space<semaphore_mem>> -> memref<1x1x!tpu.dma_semaphore, #tpu.memory_space<semaphore_mem>>
      %168 = tpu.memref_squeeze %167 : memref<1x1x!tpu.dma_semaphore, #tpu.memory_space<semaphore_mem>> -> memref<!tpu.dma_semaphore, #tpu.memory_space<semaphore_mem>>
      tpu.enqueue_dma source(%164 : memref<1x256xf32, #tpu.memory_space<any>>) target(%166 : memref<1x256xf32, #tpu.memory_space<vmem>>) target_semaphore(%168 : memref<!tpu.dma_semaphore, #tpu.memory_space<semaphore_mem>>)
    } else {
    }
    %c1_i32_1 = arith.constant 1 : i32
    %4 = arith.addi %arg1, %c1_i32_1 : i32
    %c3_i32 = arith.constant 3 : i32
    %5 = arith.cmpi slt, %4, %c3_i32 : i32
    %6 = arith.extui %5 : i1 to i32
    %c0_i32_2 = arith.constant 0 : i32
    %7 = arith.cmpi ne, %6, %c0_i32_2 : i32
    scf.if %7 {
      %c1_i32_84 = arith.constant 1 : i32
      %155 = arith.addi %arg1, %c1_i32_84 : i32
      %c1_i32_85 = arith.constant 1 : i32
      %156 = arith.addi %arg1, %c1_i32_85 : i32
      %c1_i32_86 = arith.constant 1 : i32
      %157 = arith.andi %156, %c1_i32_86 : i32
      %c128_i32_87 = arith.constant 128 : i32
      %158 = arith.muli %155, %c128_i32_87 : i32
      %159 = tpu.assume_multiple %158, 128 : i32
      %c0_i32_88 = arith.constant 0 : i32
      %c0_i32_89 = arith.constant 0 : i32
      %160 = tpu.memref_slice %arg2[%arg0, %c0_i32_89, %159] : memref<2x48x512xf32, #tpu.memory_space<any>> -> memref<1x48x256xf32, #tpu.memory_space<any>>
      %161 = tpu.memref_squeeze %160 : memref<1x48x256xf32, #tpu.memory_space<any>> -> memref<48x256xf32, #tpu.memory_space<any>>
      %c0_i32_90 = arith.constant 0 : i32
      %c0_i32_91 = arith.constant 0 : i32
      %162 = tpu.memref_slice %arg13[%157, %c0_i32_90, %c0_i32_91] : memref<2x48x256xf32, #tpu.memory_space<vmem>> -> memref<1x48x256xf32, #tpu.memory_space<vmem>>
      %163 = tpu.memref_squeeze %162 : memref<1x48x256xf32, #tpu.memory_space<vmem>> -> memref<48x256xf32, #tpu.memory_space<vmem>>
      %164 = tpu.memref_slice %arg15[%c0_i32_88, %157] : memref<2x2x!tpu.dma_semaphore, #tpu.memory_space<semaphore_mem>> -> memref<1x1x!tpu.dma_semaphore, #tpu.memory_space<semaphore_mem>>
      %165 = tpu.memref_squeeze %164 : memref<1x1x!tpu.dma_semaphore, #tpu.memory_space<semaphore_mem>> -> memref<!tpu.dma_semaphore, #tpu.memory_space<semaphore_mem>>
      tpu.enqueue_dma source(%161 : memref<48x256xf32, #tpu.memory_space<any>>) target(%163 : memref<48x256xf32, #tpu.memory_space<vmem>>) target_semaphore(%165 : memref<!tpu.dma_semaphore, #tpu.memory_space<semaphore_mem>>)
      %c1_i32_92 = arith.constant 1 : i32
      %c0_i32_93 = arith.constant 0 : i32
      %166 = tpu.memref_slice %arg3[%arg0, %c0_i32_93, %159] : memref<2x1x512xf32, #tpu.memory_space<any>> -> memref<1x1x256xf32, #tpu.memory_space<any>>
      %167 = tpu.memref_squeeze %166 : memref<1x1x256xf32, #tpu.memory_space<any>> -> memref<1x256xf32, #tpu.memory_space<any>>
      %c0_i32_94 = arith.constant 0 : i32
      %c0_i32_95 = arith.constant 0 : i32
      %168 = tpu.memref_slice %arg14[%157, %c0_i32_94, %c0_i32_95] : memref<2x1x256xf32, #tpu.memory_space<vmem>> -> memref<1x1x256xf32, #tpu.memory_space<vmem>>
      %169 = tpu.memref_squeeze %168 : memref<1x1x256xf32, #tpu.memory_space<vmem>> -> memref<1x256xf32, #tpu.memory_space<vmem>>
      %170 = tpu.memref_slice %arg15[%c1_i32_92, %157] : memref<2x2x!tpu.dma_semaphore, #tpu.memory_space<semaphore_mem>> -> memref<1x1x!tpu.dma_semaphore, #tpu.memory_space<semaphore_mem>>
      %171 = tpu.memref_squeeze %170 : memref<1x1x!tpu.dma_semaphore, #tpu.memory_space<semaphore_mem>> -> memref<!tpu.dma_semaphore, #tpu.memory_space<semaphore_mem>>
      tpu.enqueue_dma source(%167 : memref<1x256xf32, #tpu.memory_space<any>>) target(%169 : memref<1x256xf32, #tpu.memory_space<vmem>>) target_semaphore(%171 : memref<!tpu.dma_semaphore, #tpu.memory_space<semaphore_mem>>)
    } else {
    }
    %c128_i32 = arith.constant 128 : i32
    %8 = arith.muli %arg1, %c128_i32 : i32
    %9 = tpu.assume_multiple %8, 128 : i32
    %c0_i32_3 = arith.constant 0 : i32
    %c0_i32_4 = arith.constant 0 : i32
    %10 = tpu.memref_slice %arg2[%arg0, %c0_i32_4, %9] : memref<2x48x512xf32, #tpu.memory_space<any>> -> memref<1x48x256xf32, #tpu.memory_space<any>>
    %11 = tpu.memref_squeeze %10 : memref<1x48x256xf32, #tpu.memory_space<any>> -> memref<48x256xf32, #tpu.memory_space<any>>
    %c0_i32_5 = arith.constant 0 : i32
    %c0_i32_6 = arith.constant 0 : i32
    %12 = tpu.memref_slice %arg13[%0, %c0_i32_5, %c0_i32_6] : memref<2x48x256xf32, #tpu.memory_space<vmem>> -> memref<1x48x256xf32, #tpu.memory_space<vmem>>
    %13 = tpu.memref_squeeze %12 : memref<1x48x256xf32, #tpu.memory_space<vmem>> -> memref<48x256xf32, #tpu.memory_space<vmem>>
    %14 = tpu.memref_slice %arg15[%c0_i32_3, %0] : memref<2x2x!tpu.dma_semaphore, #tpu.memory_space<semaphore_mem>> -> memref<1x1x!tpu.dma_semaphore, #tpu.memory_space<semaphore_mem>>
    %15 = tpu.memref_squeeze %14 : memref<1x1x!tpu.dma_semaphore, #tpu.memory_space<semaphore_mem>> -> memref<!tpu.dma_semaphore, #tpu.memory_space<semaphore_mem>>
    tpu.wait_dma2 semaphore(%15 : memref<!tpu.dma_semaphore, #tpu.memory_space<semaphore_mem>>) src(%11 : memref<48x256xf32, #tpu.memory_space<any>>) dst(%13 : memref<48x256xf32, #tpu.memory_space<vmem>>)
    %c1_i32_7 = arith.constant 1 : i32
    %c0_i32_8 = arith.constant 0 : i32
    %16 = tpu.memref_slice %arg3[%arg0, %c0_i32_8, %9] : memref<2x1x512xf32, #tpu.memory_space<any>> -> memref<1x1x256xf32, #tpu.memory_space<any>>
    %17 = tpu.memref_squeeze %16 : memref<1x1x256xf32, #tpu.memory_space<any>> -> memref<1x256xf32, #tpu.memory_space<any>>
    %c0_i32_9 = arith.constant 0 : i32
    %c0_i32_10 = arith.constant 0 : i32
    %18 = tpu.memref_slice %arg14[%0, %c0_i32_9, %c0_i32_10] : memref<2x1x256xf32, #tpu.memory_space<vmem>> -> memref<1x1x256xf32, #tpu.memory_space<vmem>>
    %19 = tpu.memref_squeeze %18 : memref<1x1x256xf32, #tpu.memory_space<vmem>> -> memref<1x256xf32, #tpu.memory_space<vmem>>
    %20 = tpu.memref_slice %arg15[%c1_i32_7, %0] : memref<2x2x!tpu.dma_semaphore, #tpu.memory_space<semaphore_mem>> -> memref<1x1x!tpu.dma_semaphore, #tpu.memory_space<semaphore_mem>>
    %21 = tpu.memref_squeeze %20 : memref<1x1x!tpu.dma_semaphore, #tpu.memory_space<semaphore_mem>> -> memref<!tpu.dma_semaphore, #tpu.memory_space<semaphore_mem>>
    tpu.wait_dma2 semaphore(%21 : memref<!tpu.dma_semaphore, #tpu.memory_space<semaphore_mem>>) src(%17 : memref<1x256xf32, #tpu.memory_space<any>>) dst(%19 : memref<1x256xf32, #tpu.memory_space<vmem>>)
    %22 = arith.index_cast %0 : i32 to index
    %c0 = arith.constant 0 : index
    %c0_11 = arith.constant 0 : index
    %23 = vector.load %arg13[%22, %c0, %c0_11] : memref<2x48x256xf32, #tpu.memory_space<vmem>>, vector<1x48x256xf32>
    %24 = vector.shape_cast %23 : vector<1x48x256xf32> to vector<48x256xf32>
    %25 = vector.extract_strided_slice %24 {offsets = [0, 0], sizes = [48, 158], strides = [1, 1]} : vector<48x256xf32> to vector<48x158xf32>
    %26 = arith.index_cast %0 : i32 to index
    %c0_12 = arith.constant 0 : index
    %c0_13 = arith.constant 0 : index
    %27 = vector.load %arg14[%26, %c0_12, %c0_13] : memref<2x1x256xf32, #tpu.memory_space<vmem>>, vector<1x1x256xf32>
    %28 = vector.shape_cast %27 : vector<1x1x256xf32> to vector<1x256xf32>
    %29 = vector.extract_strided_slice %28 {offsets = [0, 0], sizes = [1, 158], strides = [1, 1]} : vector<1x256xf32> to vector<1x158xf32>
    %30 = tpu.iota {dimensions = array<i32: 1>} : vector<1x158xi32>
    %c128_i32_14 = arith.constant 128 : i32
    %31 = arith.muli %arg1, %c128_i32_14 : i32
    %32 = vector.broadcast %31 : i32 to vector<1x158xi32>
    %33 = arith.addi %30, %32 : vector<1x158xi32>
    %c15_i32 = arith.constant 15 : i32
    %34 = vector.broadcast %c15_i32 : i32 to vector<1x158xi32>
    %35 = arith.cmpi sge, %33, %34 : vector<1x158xi32>
    %c315_i32 = arith.constant 315 : i32
    %36 = vector.broadcast %c315_i32 : i32 to vector<1x158xi32>
    %37 = arith.cmpi slt, %33, %36 : vector<1x158xi32>
    %38 = arith.andi %35, %37 : vector<1x158xi1>
    %39 = arith.extui %38 : vector<1x158xi1> to vector<1x158xi32>
    %40 = arith.sitofp %39 : vector<1x158xi32> to vector<1x158xf32>
    %c0_15 = arith.constant 0 : index
    %c0_16 = arith.constant 0 : index
    %41 = vector.load %arg4[%c0_15, %c0_16] : memref<32x48xf32, #tpu.memory_space<vmem>>, vector<32x48xf32>
    %cst = arith.constant dense<0.000000e+00> : vector<32x158xf32>
    %42 = tpu.matmul %41, %25, %cst {dimension_numbers = #tpu.dot_dimension_numbers<[1], [0], [0], [1], [0, 0, 1, 1], [], []>} : vector<32x48xf32>, vector<48x158xf32>, vector<32x158xf32> -> vector<32x158xf32>
    %c0_17 = arith.constant 0 : index
    %c0_18 = arith.constant 0 : index
    %43 = vector.load %arg5[%c0_17, %c0_18] : memref<32x1xf32, #tpu.memory_space<vmem>>, vector<32x1xf32>
    %44 = vector.broadcast %43 : vector<32x1xf32> to vector<32x158xf32>
    %45 = arith.addf %42, %44 : vector<32x158xf32>
    %46 = vector.broadcast %40 : vector<1x158xf32> to vector<32x158xf32>
    %47 = arith.mulf %45, %46 : vector<32x158xf32>
    %48 = vector.extract_strided_slice %47 {offsets = [0, 0], sizes = [32, 156], strides = [1, 1]} : vector<32x158xf32> to vector<32x156xf32>
    %49 = vector.extract_strided_slice %47 {offsets = [0, 1], sizes = [32, 156], strides = [1, 1]} : vector<32x158xf32> to vector<32x156xf32>
    %50 = vector.extract_strided_slice %47 {offsets = [0, 2], sizes = [32, 156], strides = [1, 1]} : vector<32x158xf32> to vector<32x156xf32>
    %51 = tpu.concatenate %48, %49, %50 in 0 : vector<32x156xf32>, vector<32x156xf32>, vector<32x156xf32> -> vector<96x156xf32>
    %c0_19 = arith.constant 0 : index
    %c0_20 = arith.constant 0 : index
    %c0_21 = arith.constant 0 : index
    %52 = vector.load %arg6[%c0_19, %c0_20, %c0_21] : memref<4x32x96xf32, #tpu.memory_space<vmem>>, vector<1x32x96xf32>
    %53 = vector.shape_cast %52 : vector<1x32x96xf32> to vector<32x96xf32>
    %cst_22 = arith.constant dense<0.000000e+00> : vector<32x156xf32>
    %54 = tpu.matmul %53, %51, %cst_22 {dimension_numbers = #tpu.dot_dimension_numbers<[1], [0], [0], [1], [0, 0, 1, 1], [], []>} : vector<32x96xf32>, vector<96x156xf32>, vector<32x156xf32> -> vector<32x156xf32>
    %c0_23 = arith.constant 0 : index
    %c0_24 = arith.constant 0 : index
    %c0_25 = arith.constant 0 : index
    %55 = vector.load %arg7[%c0_23, %c0_24, %c0_25] : memref<4x32x1xf32, #tpu.memory_space<vmem>>, vector<1x32x1xf32>
    %56 = vector.shape_cast %55 : vector<1x32x1xf32> to vector<32x1xf32>
    %57 = vector.broadcast %56 : vector<32x1xf32> to vector<32x156xf32>
    %58 = arith.addf %54, %57 : vector<32x156xf32>
    %cst_26 = arith.constant 0.000000e+00 : f32
    %59 = vector.broadcast %cst_26 : f32 to vector<32x156xf32>
    %60 = arith.maximumf %58, %59 : vector<32x156xf32>
    %c0_27 = arith.constant 0 : index
    %c0_28 = arith.constant 0 : index
    %c0_29 = arith.constant 0 : index
    %61 = vector.load %arg8[%c0_27, %c0_28, %c0_29] : memref<4x32x32xf32, #tpu.memory_space<vmem>>, vector<1x32x32xf32>
    %62 = vector.shape_cast %61 : vector<1x32x32xf32> to vector<32x32xf32>
    %cst_30 = arith.constant dense<0.000000e+00> : vector<32x156xf32>
    %63 = tpu.matmul %62, %60, %cst_30 {dimension_numbers = #tpu.dot_dimension_numbers<[1], [0], [0], [1], [0, 0, 1, 1], [], []>} : vector<32x32xf32>, vector<32x156xf32>, vector<32x156xf32> -> vector<32x156xf32>
    %c0_31 = arith.constant 0 : index
    %c0_32 = arith.constant 0 : index
    %c0_33 = arith.constant 0 : index
    %64 = vector.load %arg9[%c0_31, %c0_32, %c0_33] : memref<4x32x1xf32, #tpu.memory_space<vmem>>, vector<1x32x1xf32>
    %65 = vector.shape_cast %64 : vector<1x32x1xf32> to vector<32x1xf32>
    %66 = vector.broadcast %65 : vector<32x1xf32> to vector<32x156xf32>
    %67 = arith.addf %63, %66 : vector<32x156xf32>
    %68 = vector.extract_strided_slice %29 {offsets = [0, 1], sizes = [1, 156], strides = [1, 1]} : vector<1x158xf32> to vector<1x156xf32>
    %69 = arith.addf %49, %67 : vector<32x156xf32>
    %70 = vector.broadcast %68 : vector<1x156xf32> to vector<32x156xf32>
    %71 = arith.mulf %69, %70 : vector<32x156xf32>
    %72 = vector.extract_strided_slice %71 {offsets = [0, 0], sizes = [32, 152], strides = [1, 1]} : vector<32x156xf32> to vector<32x152xf32>
    %73 = vector.extract_strided_slice %71 {offsets = [0, 2], sizes = [32, 152], strides = [1, 1]} : vector<32x156xf32> to vector<32x152xf32>
    %74 = vector.extract_strided_slice %71 {offsets = [0, 4], sizes = [32, 152], strides = [1, 1]} : vector<32x156xf32> to vector<32x152xf32>
    %75 = tpu.concatenate %72, %73, %74 in 0 : vector<32x152xf32>, vector<32x152xf32>, vector<32x152xf32> -> vector<96x152xf32>
    %c1 = arith.constant 1 : index
    %c0_34 = arith.constant 0 : index
    %c0_35 = arith.constant 0 : index
    %76 = vector.load %arg6[%c1, %c0_34, %c0_35] : memref<4x32x96xf32, #tpu.memory_space<vmem>>, vector<1x32x96xf32>
    %77 = vector.shape_cast %76 : vector<1x32x96xf32> to vector<32x96xf32>
    %cst_36 = arith.constant dense<0.000000e+00> : vector<32x152xf32>
    %78 = tpu.matmul %77, %75, %cst_36 {dimension_numbers = #tpu.dot_dimension_numbers<[1], [0], [0], [1], [0, 0, 1, 1], [], []>} : vector<32x96xf32>, vector<96x152xf32>, vector<32x152xf32> -> vector<32x152xf32>
    %c1_37 = arith.constant 1 : index
    %c0_38 = arith.constant 0 : index
    %c0_39 = arith.constant 0 : index
    %79 = vector.load %arg7[%c1_37, %c0_38, %c0_39] : memref<4x32x1xf32, #tpu.memory_space<vmem>>, vector<1x32x1xf32>
    %80 = vector.shape_cast %79 : vector<1x32x1xf32> to vector<32x1xf32>
    %81 = vector.broadcast %80 : vector<32x1xf32> to vector<32x152xf32>
    %82 = arith.addf %78, %81 : vector<32x152xf32>
    %cst_40 = arith.constant 0.000000e+00 : f32
    %83 = vector.broadcast %cst_40 : f32 to vector<32x152xf32>
    %84 = arith.maximumf %82, %83 : vector<32x152xf32>
    %c1_41 = arith.constant 1 : index
    %c0_42 = arith.constant 0 : index
    %c0_43 = arith.constant 0 : index
    %85 = vector.load %arg8[%c1_41, %c0_42, %c0_43] : memref<4x32x32xf32, #tpu.memory_space<vmem>>, vector<1x32x32xf32>
    %86 = vector.shape_cast %85 : vector<1x32x32xf32> to vector<32x32xf32>
    %cst_44 = arith.constant dense<0.000000e+00> : vector<32x152xf32>
    %87 = tpu.matmul %86, %84, %cst_44 {dimension_numbers = #tpu.dot_dimension_numbers<[1], [0], [0], [1], [0, 0, 1, 1], [], []>} : vector<32x32xf32>, vector<32x152xf32>, vector<32x152xf32> -> vector<32x152xf32>
    %c1_45 = arith.constant 1 : index
    %c0_46 = arith.constant 0 : index
    %c0_47 = arith.constant 0 : index
    %88 = vector.load %arg9[%c1_45, %c0_46, %c0_47] : memref<4x32x1xf32, #tpu.memory_space<vmem>>, vector<1x32x1xf32>
    %89 = vector.shape_cast %88 : vector<1x32x1xf32> to vector<32x1xf32>
    %90 = vector.broadcast %89 : vector<32x1xf32> to vector<32x152xf32>
    %91 = arith.addf %87, %90 : vector<32x152xf32>
    %92 = vector.extract_strided_slice %29 {offsets = [0, 3], sizes = [1, 152], strides = [1, 1]} : vector<1x158xf32> to vector<1x152xf32>
    %93 = arith.addf %73, %91 : vector<32x152xf32>
    %94 = vector.broadcast %92 : vector<1x152xf32> to vector<32x152xf32>
    %95 = arith.mulf %93, %94 : vector<32x152xf32>
    %96 = vector.extract_strided_slice %95 {offsets = [0, 0], sizes = [32, 144], strides = [1, 1]} : vector<32x152xf32> to vector<32x144xf32>
    %97 = vector.extract_strided_slice %95 {offsets = [0, 4], sizes = [32, 144], strides = [1, 1]} : vector<32x152xf32> to vector<32x144xf32>
    %98 = vector.extract_strided_slice %95 {offsets = [0, 8], sizes = [32, 144], strides = [1, 1]} : vector<32x152xf32> to vector<32x144xf32>
    %99 = tpu.concatenate %96, %97, %98 in 0 : vector<32x144xf32>, vector<32x144xf32>, vector<32x144xf32> -> vector<96x144xf32>
    %c2 = arith.constant 2 : index
    %c0_48 = arith.constant 0 : index
    %c0_49 = arith.constant 0 : index
    %100 = vector.load %arg6[%c2, %c0_48, %c0_49] : memref<4x32x96xf32, #tpu.memory_space<vmem>>, vector<1x32x96xf32>
    %101 = vector.shape_cast %100 : vector<1x32x96xf32> to vector<32x96xf32>
    %cst_50 = arith.constant dense<0.000000e+00> : vector<32x144xf32>
    %102 = tpu.matmul %101, %99, %cst_50 {dimension_numbers = #tpu.dot_dimension_numbers<[1], [0], [0], [1], [0, 0, 1, 1], [], []>} : vector<32x96xf32>, vector<96x144xf32>, vector<32x144xf32> -> vector<32x144xf32>
    %c2_51 = arith.constant 2 : index
    %c0_52 = arith.constant 0 : index
    %c0_53 = arith.constant 0 : index
    %103 = vector.load %arg7[%c2_51, %c0_52, %c0_53] : memref<4x32x1xf32, #tpu.memory_space<vmem>>, vector<1x32x1xf32>
    %104 = vector.shape_cast %103 : vector<1x32x1xf32> to vector<32x1xf32>
    %105 = vector.broadcast %104 : vector<32x1xf32> to vector<32x144xf32>
    %106 = arith.addf %102, %105 : vector<32x144xf32>
    %cst_54 = arith.constant 0.000000e+00 : f32
    %107 = vector.broadcast %cst_54 : f32 to vector<32x144xf32>
    %108 = arith.maximumf %106, %107 : vector<32x144xf32>
    %c2_55 = arith.constant 2 : index
    %c0_56 = arith.constant 0 : index
    %c0_57 = arith.constant 0 : index
    %109 = vector.load %arg8[%c2_55, %c0_56, %c0_57] : memref<4x32x32xf32, #tpu.memory_space<vmem>>, vector<1x32x32xf32>
    %110 = vector.shape_cast %109 : vector<1x32x32xf32> to vector<32x32xf32>
    %cst_58 = arith.constant dense<0.000000e+00> : vector<32x144xf32>
    %111 = tpu.matmul %110, %108, %cst_58 {dimension_numbers = #tpu.dot_dimension_numbers<[1], [0], [0], [1], [0, 0, 1, 1], [], []>} : vector<32x32xf32>, vector<32x144xf32>, vector<32x144xf32> -> vector<32x144xf32>
    %c2_59 = arith.constant 2 : index
    %c0_60 = arith.constant 0 : index
    %c0_61 = arith.constant 0 : index
    %112 = vector.load %arg9[%c2_59, %c0_60, %c0_61] : memref<4x32x1xf32, #tpu.memory_space<vmem>>, vector<1x32x1xf32>
    %113 = vector.shape_cast %112 : vector<1x32x1xf32> to vector<32x1xf32>
    %114 = vector.broadcast %113 : vector<32x1xf32> to vector<32x144xf32>
    %115 = arith.addf %111, %114 : vector<32x144xf32>
    %116 = vector.extract_strided_slice %29 {offsets = [0, 7], sizes = [1, 144], strides = [1, 1]} : vector<1x158xf32> to vector<1x144xf32>
    %117 = arith.addf %97, %115 : vector<32x144xf32>
    %118 = vector.broadcast %116 : vector<1x144xf32> to vector<32x144xf32>
    %119 = arith.mulf %117, %118 : vector<32x144xf32>
    %120 = vector.extract_strided_slice %119 {offsets = [0, 0], sizes = [32, 128], strides = [1, 1]} : vector<32x144xf32> to vector<32x128xf32>
    %121 = vector.extract_strided_slice %119 {offsets = [0, 8], sizes = [32, 128], strides = [1, 1]} : vector<32x144xf32> to vector<32x128xf32>
    %122 = vector.extract_strided_slice %119 {offsets = [0, 16], sizes = [32, 128], strides = [1, 1]} : vector<32x144xf32> to vector<32x128xf32>
    %123 = tpu.concatenate %120, %121, %122 in 0 : vector<32x128xf32>, vector<32x128xf32>, vector<32x128xf32> -> vector<96x128xf32>
    %c3 = arith.constant 3 : index
    %c0_62 = arith.constant 0 : index
    %c0_63 = arith.constant 0 : index
    %124 = vector.load %arg6[%c3, %c0_62, %c0_63] : memref<4x32x96xf32, #tpu.memory_space<vmem>>, vector<1x32x96xf32>
    %125 = vector.shape_cast %124 : vector<1x32x96xf32> to vector<32x96xf32>
    %cst_64 = arith.constant dense<0.000000e+00> : vector<32x128xf32>
    %126 = tpu.matmul %125, %123, %cst_64 {dimension_numbers = #tpu.dot_dimension_numbers<[1], [0], [0], [1], [0, 0, 1, 1], [], []>} : vector<32x96xf32>, vector<96x128xf32>, vector<32x128xf32> -> vector<32x128xf32>
    %c3_65 = arith.constant 3 : index
    %c0_66 = arith.constant 0 : index
    %c0_67 = arith.constant 0 : index
    %127 = vector.load %arg7[%c3_65, %c0_66, %c0_67] : memref<4x32x1xf32, #tpu.memory_space<vmem>>, vector<1x32x1xf32>
    %128 = vector.shape_cast %127 : vector<1x32x1xf32> to vector<32x1xf32>
    %129 = vector.broadcast %128 : vector<32x1xf32> to vector<32x128xf32>
    %130 = arith.addf %126, %129 : vector<32x128xf32>
    %cst_68 = arith.constant 0.000000e+00 : f32
    %131 = vector.broadcast %cst_68 : f32 to vector<32x128xf32>
    %132 = arith.maximumf %130, %131 : vector<32x128xf32>
    %c3_69 = arith.constant 3 : index
    %c0_70 = arith.constant 0 : index
    %c0_71 = arith.constant 0 : index
    %133 = vector.load %arg8[%c3_69, %c0_70, %c0_71] : memref<4x32x32xf32, #tpu.memory_space<vmem>>, vector<1x32x32xf32>
    %134 = vector.shape_cast %133 : vector<1x32x32xf32> to vector<32x32xf32>
    %cst_72 = arith.constant dense<0.000000e+00> : vector<32x128xf32>
    %135 = tpu.matmul %134, %132, %cst_72 {dimension_numbers = #tpu.dot_dimension_numbers<[1], [0], [0], [1], [0, 0, 1, 1], [], []>} : vector<32x32xf32>, vector<32x128xf32>, vector<32x128xf32> -> vector<32x128xf32>
    %c3_73 = arith.constant 3 : index
    %c0_74 = arith.constant 0 : index
    %c0_75 = arith.constant 0 : index
    %136 = vector.load %arg9[%c3_73, %c0_74, %c0_75] : memref<4x32x1xf32, #tpu.memory_space<vmem>>, vector<1x32x1xf32>
    %137 = vector.shape_cast %136 : vector<1x32x1xf32> to vector<32x1xf32>
    %138 = vector.broadcast %137 : vector<32x1xf32> to vector<32x128xf32>
    %139 = arith.addf %135, %138 : vector<32x128xf32>
    %140 = vector.extract_strided_slice %29 {offsets = [0, 15], sizes = [1, 128], strides = [1, 1]} : vector<1x158xf32> to vector<1x128xf32>
    %141 = arith.addf %121, %139 : vector<32x128xf32>
    %142 = vector.broadcast %140 : vector<1x128xf32> to vector<32x128xf32>
    %143 = arith.mulf %141, %142 : vector<32x128xf32>
    %c0_76 = arith.constant 0 : index
    %c0_77 = arith.constant 0 : index
    %144 = vector.load %arg10[%c0_76, %c0_77] : memref<16x32xf32, #tpu.memory_space<vmem>>, vector<16x32xf32>
    %cst_78 = arith.constant dense<0.000000e+00> : vector<16x128xf32>
    %145 = tpu.matmul %144, %143, %cst_78 {dimension_numbers = #tpu.dot_dimension_numbers<[1], [0], [0], [1], [0, 0, 1, 1], [], []>} : vector<16x32xf32>, vector<32x128xf32>, vector<16x128xf32> -> vector<16x128xf32>
    %c0_79 = arith.constant 0 : index
    %c0_80 = arith.constant 0 : index
    %146 = vector.load %arg11[%c0_79, %c0_80] : memref<16x1xf32, #tpu.memory_space<vmem>>, vector<16x1xf32>
    %147 = vector.broadcast %146 : vector<16x1xf32> to vector<16x128xf32>
    %148 = arith.addf %145, %147 : vector<16x128xf32>
    %149 = vector.extract_strided_slice %29 {offsets = [0, 15], sizes = [1, 128], strides = [1, 1]} : vector<1x158xf32> to vector<1x128xf32>
    %150 = vector.broadcast %149 : vector<1x128xf32> to vector<16x128xf32>
    %151 = arith.mulf %148, %150 : vector<16x128xf32>
    %c0_81 = arith.constant 0 : index
    %c0_82 = arith.constant 0 : index
    %c0_83 = arith.constant 0 : index
    %152 = vector.load %arg12[%c0_81, %c0_82, %c0_83] : memref<1x16x128xf32, #tpu.memory_space<vmem>>, vector<1x16x128xf32>
    %153 = vector.shape_cast %152 : vector<1x16x128xf32> to vector<16x128xf32>
    %154 = vector.shape_cast %151 : vector<16x128xf32> to vector<1x16x128xf32>
    tpu.vector_store %arg12[%c0_81, %c0_82, %c0_83], %154 {strides = array<i32>} : memref<1x16x128xf32, #tpu.memory_space<vmem>>, vector<1x16x128xf32>,
    return
  }
  func.func @transform_2(%arg0: i32, %arg1: i32) -> (i32, i32) {
    %c0_i32 = arith.constant 0 : i32
    %c0_i32_0 = arith.constant 0 : i32
    %c0_i32_1 = arith.constant 0 : i32
    return %c0_i32, %c0_i32_0 : i32, i32
  }
  func.func @transform_3(%arg0: i32, %arg1: i32) -> (i32, i32) {
    %c0_i32 = arith.constant 0 : i32
    %c0_i32_0 = arith.constant 0 : i32
    %c0_i32_1 = arith.constant 0 : i32
    return %c0_i32, %c0_i32_0 : i32, i32
  }
  func.func @transform_4(%arg0: i32, %arg1: i32) -> (i32, i32, i32) {
    %c0_i32 = arith.constant 0 : i32
    %c0_i32_0 = arith.constant 0 : i32
    %c0_i32_1 = arith.constant 0 : i32
    %c0_i32_2 = arith.constant 0 : i32
    return %c0_i32, %c0_i32_0, %c0_i32_1 : i32, i32, i32
  }
  func.func @transform_5(%arg0: i32, %arg1: i32) -> (i32, i32, i32) {
    %c0_i32 = arith.constant 0 : i32
    %c0_i32_0 = arith.constant 0 : i32
    %c0_i32_1 = arith.constant 0 : i32
    %c0_i32_2 = arith.constant 0 : i32
    return %c0_i32, %c0_i32_0, %c0_i32_1 : i32, i32, i32
  }
  func.func @transform_6(%arg0: i32, %arg1: i32) -> (i32, i32, i32) {
    %c0_i32 = arith.constant 0 : i32
    %c0_i32_0 = arith.constant 0 : i32
    %c0_i32_1 = arith.constant 0 : i32
    %c0_i32_2 = arith.constant 0 : i32
    return %c0_i32, %c0_i32_0, %c0_i32_1 : i32, i32, i32
  }
  func.func @transform_7(%arg0: i32, %arg1: i32) -> (i32, i32, i32) {
    %c0_i32 = arith.constant 0 : i32
    %c0_i32_0 = arith.constant 0 : i32
    %c0_i32_1 = arith.constant 0 : i32
    %c0_i32_2 = arith.constant 0 : i32
    return %c0_i32, %c0_i32_0, %c0_i32_1 : i32, i32, i32
  }
  func.func @transform_8(%arg0: i32, %arg1: i32) -> (i32, i32) {
    %c0_i32 = arith.constant 0 : i32
    %c0_i32_0 = arith.constant 0 : i32
    %c0_i32_1 = arith.constant 0 : i32
    return %c0_i32, %c0_i32_0 : i32, i32
  }
  func.func @transform_9(%arg0: i32, %arg1: i32) -> (i32, i32) {
    %c0_i32 = arith.constant 0 : i32
    %c0_i32_0 = arith.constant 0 : i32
    %c0_i32_1 = arith.constant 0 : i32
    return %c0_i32, %c0_i32_0 : i32, i32
  }
  func.func @transform_10(%arg0: i32, %arg1: i32) -> (i32, i32, i32) {
    %c0_i32 = arith.constant 0 : i32
    %c0_i32_0 = arith.constant 0 : i32
    return %arg0, %c0_i32, %arg1 : i32, i32, i32
  }
}

</mosaic_0001>

<bundles_post_ra>
// kernel: tpu_custom_call.1
= control target key start
LH: loop header
LB: loop body
LE: loop exit
PB: predicated region body
PF: predicated region fallthrough
CT: control target
= control target key end

     0   :  { %s4559_s0 = inlined_call_operand.hbm [shape: f32[2,48,512], index: 0, kind: input, shape index: {}]   ;;  %s4560_s1 = inlined_call_operand.vmem [shape: f32[2,1,512], index: 1, kind: input, shape index: {}]   ;;  %s4561_s2 = inlined_call_operand.vmem [shape: f32[32,48], index: 2, kind: input, shape index: {}]   ;;  %s4562_s3 = inlined_call_operand.vmem [shape: f32[32,1], index: 3, kind: input, shape index: {}]   ;;  %s4563_s4 = inlined_call_operand.vmem [shape: f32[4,32,96], index: 4, kind: input, shape index: {}]   ;;  %s4564_s5 = inlined_call_operand.vmem [shape: f32[4,32,1], index: 5, kind: input, shape index: {}]   ;;  %s4565_s6 = inlined_call_operand.vmem [shape: f32[4,32,32], index: 6, kind: input, shape index: {}]   ;;  %s4566_s7 = inlined_call_operand.vmem [shape: f32[4,32,1], index: 7, kind: input, shape index: {}]   ;;  %s4567_s8 = inlined_call_operand.vmem [shape: f32[16,32], index: 8, kind: input, shape index: {}]   ;;  %s4568_s9 = inlined_call_operand.vmem [shape: f32[16,1], index: 9, kind: input, shape index: {}]   ;;  %s4569_s10 = inlined_call_operand.hbm [shape: f32[2,16,384], index: 10, kind: output, shape index: {}]  }
   0x1   :  { %4584 = sst [smem:[#allocation25_spill]] %s4559_s0 }
   0x2   :  { %4585 = sst [smem:[#allocation26_spill]] %s4569_s10 }
   0x3   :  { %15 = vsyncpa [#allocation6], 0 }
   0x4   :  { %17 = vsyncpa [#allocation6 + $0x1], 0  ;;  %s3689_s13 = smov 0   ;;  %s3691_s14 = smov 0  }
   0x5   :  { %s3693_s15 = smov 0   ;;  %s3695_s16 = smov 0  }
   0x6   :  { %s3697_s17 = smov 0   ;;  %s3699_s18 = smov 0  }
   0x7   :  { %s3701_s19 = smov 0   ;;  %s3703_s20 = smov 0  }
   0x8 LB: > { %4586 = sst [smem:[#allocation14_spill]] %s3578_s13  ;;  %s2649_s21 = sadd.s32 4294967295, %s3606_s20   ;;  %s3606_s20 = sphi %s3703_s20, %s23_s20   ;;  %s3602_s19 = sphi %s3701_s19, %s4615_s19   ;;  %s3598_s18 = sphi %s3699_s18, %s4614_s18   ;;  %s3594_s17 = sphi %s3697_s17, %s4613_s17   ;;  %s3590_s16 = sphi %s3695_s16, %s4612_s16   ;;  %s3586_s15 = sphi %s3693_s15, %s4611_s15   ;;  %s3582_s14 = sphi %s3691_s14, %s4610_s14   ;;  %s3578_s13 = sphi %s3689_s13, %s4609_s13  }
   0x9   : > { %4587 = sst [smem:[#allocation15_spill]] %s3582_s14  ;;  %s2650_s22 = sadd.s32 4294967294, %s3606_s20  }
   0xa   : > { %4588 = sst [smem:[#allocation16_spill]] %s3586_s15  ;;  %s32_s23 = sadd.s32 1, %s3598_s18 }
   0xb   : > { %4589 = sst [smem:[#allocation17_spill]] %s3598_s18  ;;  %p33_p0 = scmp.ge.s32.totalorder %s32_s23, 3 }
   0xc   : > { %4590 = sst [smem:[#allocation18_spill]] %s3602_s19  ;;  %s35_s24 = sadd.s32 1, %s3602_s19 }
   0xd   : > { %4591 = sst [smem:[#allocation19_spill]] %s3606_s20  ;;  %p222_p1 = scmp.ne.s32.totalorder %s3586_s15, %s3582_s14 }
   0xe   : > { %p223_p2 = scmp.eq.s32.totalorder %s2649_s21, 5  ;;  %s4617_s23 = smov (%p33_p0, %s32_s23), 0 }
   0xf   : > { %4592 = sst [smem:[#allocation20_spill]] %s4617_s23  ;;  %s4619_s24 = smov (!%p33_p0, %s35_s24), %s3602_s19 }
  0x10   : > { %s208_s25 = ssub.s32 %s3598_s18, %s4617_s23  ;;  %p3740_p3 = por %p223_p2, %p222_p1 }
  0x11   : > { %p37_p4 = scmp.ge.s32.totalorder %s4619_s24, 2  ;;  %p228_p5 = scmp.ne.s32.totalorder %s3582_s14, %s3578_s13 }
  0x12   : > { %s4593_s26 = scalar_select %p3740_p3, 1, 0 }
  0x13   : > { %p229_p6 = scmp.eq.s32.totalorder %s2650_s22, 5  ;;  %p2652_p7 = scmp.ge.s32.totalorder %s3606_s20, 1 }
  0x14   : > { %4594 = sst [smem:[#allocation21_spill]] %s4593_s26  ;;  %s4621_s24 = smov (%p37_p4, %s4619_s24), 0 }
  0x15   : > { %4595 = sst [smem:[#allocation22_spill]] %s4621_s24  ;;  %p3749_p8 = por %p229_p6, %p228_p5 }
  0x16   : > { %p271_p9 = scmp.lt.s32.totalorder %s3606_s20, 7  ;;  %s207_s28 = ssub.s32 %s3602_s19, %s4621_s24 }
  0x17   : > { %s4596_s27 = scalar_select %p3749_p8, 1, 0 }
  0x18   : > { %s212_s29 = sadd.s32 1, %s3586_s15  ;;  %s209_s30 = sor.u32 %s208_s25, %s207_s28 }
  0x19   : > { %4597 = sst [smem:[#allocation23_spill]] %s4596_s27  ;;  %p272_p10 = pnand %p2652_p7, %p271_p9 }
  0x1a   : > { %p210_p11 = scmp.eq.s32.totalorder %s209_s30, 0  ;;  %s4574_s12 = sand.u32 (!%p272_p10), 1, %s3582_s14  }
  0x1b   : > { %275 = sbr.rel (%p272_p10) target bundleno = 3927 (0xf57), region = 52  ;;  %s3762_s21 = sand.u32 (!%p272_p10), 1, %s3590_s16 }
  0x1c   : > { %s3758_s11 = scalar_select %p210_p11, %s3586_s15, %s212_s29  }
  0x1d   : > { %s2653_s22 = sshll.u32 (!%p272_p10), %s4574_s12, 4  ;;  %p2654_p12 = scmp.ne.s32.totalorder (!%p272_p10), %s3590_s16, 0 }
  0x1e   : > { %4598 = sst [smem:[#allocation24_spill]] %s3758_s11  ;;  %s3766_s23 = scalar_lea.vmem (!%p272_p10), [#allocation5], %s2653_s22 }
  0x22   : > { %304 = sbr.rel (%p2654_p12) target bundleno = 72 (0x48), region = 56  ;;  %s2655_s25 = sshll.u32 (!%p2654_p12), %s3590_s16, 7 }
  0x23   : > { %s308_s28 = smul.u32 (!%p2654_p12), 24, %s3594_s17  ;;  %s3771_s29 = sshra.s32 (!%p2654_p12), %s2655_s25, 7 }
  0x24   : > { %s2765_s30 = smul.u32 (!%p2654_p12), 96, %s3762_s21  ;;  %s4599_s0 = sld [smem:[#allocation25_spill]] (!%p2654_p12) }
  0x25   : > { %s309_s24 = sadd.s32 (!%p2654_p12), %s308_s28, %s3771_s29  ;;  %s315_s27 = scalar_lea.sflag (!%p2654_p12), [#allocation4], %s3762_s21 }
  0x26   : > { %s2656_s19 = sshll.u32 (!%p2654_p12), %s309_s24, 7  ;;  %s314_s12 = scalar_lea.vmem (!%p2654_p12), [#allocation2], %s2765_s30 }
  0x27   : > { %s317_s15 = sshll.u32 (!%p2654_p12), %s314_s12, 4  ;;  %s3780_s15 = int_to_ptr.vmem [resolvable:$true] %s317_s15 }
  0x2a   : > { %s3778_s22 = scalar_lea.hbm %s4599_s0, %s2656_s19  ;;  %s3462_s24 = scalar_lea.hbm %s4599_s0, 6144 }
  0x2b   : > { %s3460_s25 = scalar_lea.hbm %s3778_s22, 1536  ;;  %p3463_p0 = scmp.lt.u32.totalorder %s3778_s22, %s4599_s0 }
  0x2c   : > { %p3461_p13 = scmp.ne.s32.totalorder %s3778_s22, %s3460_s25  ;;  %p3464_p1 = scmp.lt.u32.totalorder %s3462_s24, %s3460_s25 }
  0x2d   : > { %p3466_p4 = scmp.lt.u32.totalorder %s3460_s25, %s3778_s22 }
  0x2e   : > { %p3465_p2 = por %p3464_p1, %p3463_p0 }
  0x30   : > { %p3467_p5 = por %p3466_p4, %p3465_p2 }
  0x32   : > { %p3468_p6 = pnand %p3467_p5, %p3461_p13 }
  0x34   : > { %3471 = shalt.err (!%p3468_p6)  }
  0x35   : > { %s3472_s18 = scalar_lea.vmem %s3780_s15, 1536  ;;  %s3608_s19 = smov [#allocation2]  }
  0x36   : > { %p3473_p7 = scmp.ne.s32.totalorder %s3780_s15, %s3472_s18  ;;  %s3474_s11 = sshll.u32 %s3608_s19, 4  ;;  %s3475_s11 = int_to_ptr.vmem [resolvable:$false] %s3474_s11 }
  0x37   : > { %s3476_s13 = scalar_lea.vmem %s3475_s11, 3072  ;;  %p3477_p9 = scmp.lt.s32.totalorder %s3780_s15, %s3475_s11 }
  0x38   : > { %p3478_p10 = scmp.lt.s32.totalorder %s3476_s13, %s3472_s18 }
  0x3a   : > { %p3479_p11 = por %p3478_p10, %p3477_p9 }
  0x3c   : > { %p3480_p12 = pnand %p3479_p11, %p3473_p7 }
  0x3e   : > { %3483 = shalt.err (!%p3480_p12)  }
  0x3f   : > { %s3609_s10 = smov 512   ;;  %s3610_s20 = smov 256  }
  0x40   : > { %s3611_s12 = smov 16   ;;  %s2571_s30 = scalar_lea.sflag %s315_s27, 2 [#allocation4] }
  0x41   : > { %320 = dma.hbm_to_vmem [thread:$0]  %s3778_s22, 1536, %s3780_s15, %s315_s27, %s3609_s10, %s3610_s20, %s3611_s12 }
  0x42   : > { %s2658_s25 = sshll.u32 %s3594_s17, 2  ;;  %s2659_s28 = sshll.u32 %s3762_s21, 1 }
  0x43   : > { %s322_s24 = sadd.s32 %s2658_s25, %s3771_s29  ;;  %s325_s13 = scalar_lea.vmem [#allocation3], %s2659_s28 }
  0x44   : > { %s323_s11 = scalar_lea.vmem %s4560_s1, %s322_s24 }
  0x45   : > { %v345_v0 = vld [vmem:[%s323_s11] sm:$0x3] }
  0x46   : > { %346 = vst [vmem:[%s325_s13] sm:$0x3] %v345_v0 }
  0x47   : > { %371 = vsyncadd %s2571_s30, 32 }
  0x48 PF: > { %s372_s26 = sadd.s32 1, %s3590_s16 }
  0x49   : > { %p2660_p13 = scmp.ge.s32.totalorder %s372_s26, 3 }
  0x4a   : > { %s3809_s14 = sand.u32 (!%p2660_p13), 1, %s372_s26  ;;  %s2766_s15 = sshll.u32 (!%p2660_p13), %s3590_s16, 7 }
  0x4b   : > { %376 = sbr.rel (%p2660_p13) target bundleno = 113 (0x71), region = 90  ;;  %s3812_s27 = sadd.s32 (!%p2660_p13), 128, %s2766_s15 }
  0x4c   : > { %s381_s29 = smul.u32 (!%p2660_p13), 24, %s3594_s17  ;;  %s379_s22 = sshra.s32 (!%p2660_p13), %s3812_s27, 7 }
  0x4d   : > { %s2768_s10 = smul.u32 (!%p2660_p13), 96, %s3809_s14  ;;  %s4600_s0 = sld [smem:[#allocation25_spill]] (!%p2660_p13) }
  0x4e   : > { %s382_s20 = sadd.s32 (!%p2660_p13), %s381_s29, %s379_s22  ;;  %s388_s18 = scalar_lea.sflag (!%p2660_p13), [#allocation4], %s3809_s14 }
  0x4f   : > { %s2662_s12 = sshll.u32 (!%p2660_p13), %s382_s20, 7  ;;  %s387_s24 = scalar_lea.vmem (!%p2660_p13), [#allocation2], %s2768_s10 }
  0x50   : > { %s390_s28 = sshll.u32 (!%p2660_p13), %s387_s24, 4  ;;  %s3824_s28 = int_to_ptr.vmem [resolvable:$true] %s390_s28 }
  0x53   : > { %s3822_s26 = scalar_lea.hbm %s4600_s0, %s2662_s12  ;;  %s3486_s15 = scalar_lea.hbm %s4600_s0, 6144 }
  0x54   : > { %s3484_s19 = scalar_lea.hbm %s3822_s26, 1536  ;;  %p3487_p1 = scmp.lt.u32.totalorder %s3822_s26, %s4600_s0 }
  0x55   : > { %p3485_p0 = scmp.ne.s32.totalorder %s3822_s26, %s3484_s19  ;;  %p3488_p2 = scmp.lt.u32.totalorder %s3486_s15, %s3484_s19 }
  0x56   : > { %p3490_p5 = scmp.lt.u32.totalorder %s3484_s19, %s3822_s26 }
  0x57   : > { %p3489_p4 = por %p3488_p2, %p3487_p1 }
  0x59   : > { %p3491_p6 = por %p3490_p5, %p3489_p4 }
  0x5b   : > { %p3492_p7 = pnand %p3491_p6, %p3485_p0 }
  0x5d   : > { %3495 = shalt.err (!%p3492_p7)  }
  0x5e   : > { %s3496_s10 = scalar_lea.vmem %s3824_s28, 1536  ;;  %s3612_s12 = smov [#allocation2]  }
  0x5f   : > { %p3497_p9 = scmp.ne.s32.totalorder %s3824_s28, %s3496_s10  ;;  %s3498_s30 = sshll.u32 %s3612_s12, 4  ;;  %s3499_s30 = int_to_ptr.vmem [resolvable:$false] %s3498_s30 }
  0x60   : > { %s3500_s25 = scalar_lea.vmem %s3499_s30, 3072  ;;  %p3501_p10 = scmp.lt.s32.totalorder %s3824_s28, %s3499_s30 }
  0x61   : > { %p3502_p11 = scmp.lt.s32.totalorder %s3500_s25, %s3496_s10 }
  0x63   : > { %p3503_p12 = por %p3502_p11, %p3501_p10 }
  0x65   : > { %p3504_p13 = pnand %p3503_p12, %p3497_p9 }
  0x67   : > { %3507 = shalt.err (!%p3504_p13)  }
  0x68   : > { %s3613_s24 = smov 512   ;;  %s3614_s19 = smov 256  }
  0x69   : > { %s3615_s11 = smov 16   ;;  %s2587_s13 = scalar_lea.sflag %s388_s18, 2 [#allocation4] }
  0x6a   : > { %393 = dma.hbm_to_vmem [thread:$0]  %s3822_s26, 1536, %s3824_s28, %s388_s18, %s3613_s24, %s3614_s19, %s3615_s11 }
  0x6b   : > { %s2664_s15 = sshll.u32 %s3594_s17, 2  ;;  %s2665_s20 = sshll.u32 %s3809_s14, 1 }
  0x6c   : > { %s395_s29 = sadd.s32 %s2664_s15, %s379_s22  ;;  %s398_s25 = scalar_lea.vmem [#allocation3], %s2665_s20 }
  0x6d   : > { %s396_s30 = scalar_lea.vmem %s4560_s1, %s395_s29 }
  0x6e   : > { %v418_v1 = vld [vmem:[%s396_s30] sm:$0x3] }
  0x6f   : > { %419 = vst [vmem:[%s398_s25] sm:$0x3] %v418_v1 }
  0x70   : > { %444 = vsyncadd %s2587_s13, 32 }
  0x71 PF: > { %s2666_s0 = sshll.u32 %s3590_s16, 7  ;;  %s2769_s26 = smul.u32 96, %s3762_s21 }
  0x72   : > { %s449_s18 = scalar_lea.sflag [#allocation4], %s3762_s21 }
  0x73   : > { %s3855_s28 = scalar_lea.vmem [#allocation2], %s2769_s26 }
  0x74   : > { %3568 = dma.done.wait %s449_s18, 1536 }
  0x75   : > { %3569 = vsyncadd %s449_s18, 4294965760  ;;  %s2668_s14 = sshll.u32 %s3762_s21, 1  ;;  %s2596_s27 = scalar_lea.sflag %s449_s18, 2 [#allocation4] }
  0x76   : > { %s3859_s22 = scalar_lea.vmem [#allocation3], %s2668_s14 }
  0x77   : > { %3570 = dma.done.wait %s2596_s27, 32 }
  0x78   : > { %3571 = vsyncadd %s2596_s27, 4294967264  ;;  %v3616_v2 = vmov 0.0   ;;  %v3617_v3 = vmov 0   ;;  %v462_v4 = vld [vmem:[%s3855_s28 + $0x8] sm:$0xff]  ;;  %v464_v5 = vld [vmem:[%s3855_s28 + $0x18] sm:$0xff]  ;;  %vm518_vm0 = vcmask 392192   ;;  %v474_v30 = vlaneseq }
  0x79   : > { %595 = vmatprep.mubr.f32.mxu0 %v3616_v2  ;;  %3098 = vset.pattern.permute.xlu0 %v3617_v3  ;;  %v461_v6 = vld [vmem:[%s3855_s28] sm:$0xff]  ;;  %v2855_v7 = vpack.c.bf16 %v464_v5, %v462_v4  ;;  %v463_v8 = vld [vmem:[%s3855_s28 + $0x10] sm:$0xff]  ;;  %v466_v9 = vld [vmem:[%s3855_s28 + $0x28] sm:$0xff]  ;;  %v477_v32 = vstv %s2666_s0  ;;  %s3618_s0 = smov 127   ;;  %s3619_s27 = smov 126   ;;  %vm652_vm7 = vcmask 1039360  }
  0x7a   : > { %3099 = vset.pattern.permute.xlu1 %v3617_v3  ;;  %799 = vmatprep.mubr.f32.mxu1 %v3616_v2  ;;  %v468_v10 = vld [vmem:[%s3855_s28 + $0x38] sm:$0xff]  ;;  %v2857_v11 = vpack.c.bf16 %v463_v8, %v461_v6  ;;  %v465_v13 = vld [vmem:[%s3855_s28 + $0x20] sm:$0xff]  ;;  %v467_v14 = vld [vmem:[%s3855_s28 + $0x30] sm:$0xff]  ;;  %v475_v31 = vand.u32 127, %v474_v30  ;;  %vm681_vm8 = vcmask 1031168   ;;  %vm722_vm9 = vcmask 785408  }
  0x7b   : > { %v2859_v12 = vpack.c.bf16 %v468_v10, %v466_v9  ;;  %v470_v15 = vld [vmem:[%s3855_s28 + $0x48] sm:$0xff]  ;;  %2856 = vmatprep.subr.bf16.mxu0 %v2855_v7  ;;  %v472_v16 = vld [vmem:[%s3855_s28 + $0x58] sm:$0xff]  ;;  %v2861_v17 = vpack.c.bf16 %v467_v14, %v465_v13  ;;  %v469_v19 = vld [vmem:[%s3855_s28 + $0x40] sm:$0xff]  ;;  %vm860_vm10 = vcmask 261120   ;;  %s3620_s21 = smov 1   ;;  %vm986_vm11 = vcmask 7168  }
  0x7c   : > { %2858 = vmatpush1.bf16.msra.mxu0 %v2857_v11  ;;  %v2863_v18 = vpack.c.bf16 %v472_v16, %v470_v15  ;;  %v471_v20 = vld [vmem:[%s3855_s28 + $0x50] sm:$0xff]  ;;  %v494_v21 = vld [vmem:[%s4562_s3] sm:$0xff]  ;;  %v495_v23 = vld [vmem:[%s4562_s3 + $0x8] sm:$0xff]  ;;  %v476_v33 = vadd.s32 128, %v475_v31  ;;  %v478_v34 = vadd.s32 %v477_v32, %v475_v31  ;;  %vm1070_vm12 = vcmask 1014784   ;;  %s3622_s28 = smov 3  }
  0x7d   : > { %2860 = vmatprep.subr.bf16.mxu0 %v2859_v12  ;;  %500 = vperm.xlu0 %3098, %v494_v21   ;;  %v496_v22 = vld [vmem:[%s4562_s3 + $0x10] sm:$0xff]  ;;  %v2865_v24 = vpack.c.bf16 %v471_v20, %v469_v19  ;;  %v497_v25 = vld [vmem:[%s4562_s3 + $0x18] sm:$0xff]  ;;  %v490_v26 = vld [vmem:[%s4561_s2] sm:$0xff]  ;;  %vm1453_vm13 = vcmask 23552   ;;  %s3623_s18 = smov 120   ;;  %s3624_s14 = smov 125  }
  0x7e   : > { %510 = vperm.xlu1 %3099, %v496_v22   ;;  %v491_v27 = vld [vmem:[%s4561_s2 + $0x8] sm:$0xff]  ;;  %v492_v28 = vld [vmem:[%s4561_s2 + $0x10] sm:$0xff]  ;;  %v493_v29 = vld [vmem:[%s4561_s2 + $0x18] sm:$0xff]  ;;  %v479_v35 = vadd.s32 %v477_v32, %v476_v33  ;;  %vm480_vm1 = vcmp.ge.s32.totalorder %v478_v34, 15  ;;  %vm482_vm2 = vcmp.lt.s32.totalorder %v478_v34, 315  ;;  %vm1526_vm14 = vcmask 982016  }
  0x7f   : > { %vm484_vm5 = vmand %vm480_vm1, %vm482_vm2  ;;  %v698_v11 = vld [vmem:[%s4564_s5] sm:$0xff]  ;;  %v699_v12 = vld [vmem:[%s4564_s5 + $0x8] sm:$0xff]  ;;  %vm1609_vm15 = vcmask 1022976   ;;  %s3625_s25 = smov 7   ;;  %s3626_s26 = smov 112   ;;  %vm1983_vm1 = vcmask 916480  }
  0x80   : > { %2862 = vmatpush1.bf16.msra.mxu0 %v2861_v17  ;;  %vm481_vm3 = vcmp.ge.s32.totalorder %v479_v35, 15  ;;  %vm483_vm4 = vcmp.lt.s32.totalorder %v479_v35, 315  ;;  %v2669_v37 = vsel %vm484_vm5, 1.0, %v3616_v2  ;;  %v700_v13 = vld [vmem:[%s4564_s5 + $0x10] sm:$0xff]  ;;  %v701_v14 = vld [vmem:[%s4564_s5 + $0x18] sm:$0xff]  ;;  %v836_v15 = vld [vmem:[%s4566_s7] sm:$0xff] }
  0x81   : > { %2864 = vmatprep.subr.bf16.mxu0 %v2863_v18  ;;  %505 = vperm.xlu0 %3098, %v495_v23   ;;  %vm485_vm6 = vmand %vm481_vm3, %vm483_vm4  ;;  %v837_v16 = vld [vmem:[%s4566_s7 + $0x8] sm:$0xff]  ;;  %v838_v17 = vld [vmem:[%s4566_s7 + $0x10] sm:$0xff]  ;;  %vm2066_vm2 = vcmask 990208   ;;  %s3628_s10 = smov 15   ;;  %vm2389_vm3 = vcmask 924672   ;;  %s4601_s19 = sld [smem:[#allocation15_spill]] }
  0x82   : > { %515 = vperm.xlu1 %3099, %v497_v25   ;;  %v2670_v40 = vsel %vm485_vm6, 1.0, %v3616_v2  ;;  %v839_v18 = vld [vmem:[%s4566_s7 + $0x18] sm:$0xff]  ;;  %s2504_s15 = sshll.u32 %s3766_s23, 4  ;;  %s4501_s15 = int_to_ptr.vmem [resolvable:$true] %s2504_s15 }
  0x83   : > { %s3508_s30 = scalar_lea.vmem %s4501_s15, 256 }
  0x84   : > { %2866 = vmatpush1.bf16.msra.mxu0 %v2865_v24  ;;  %p3509_p0 = scmp.ne.s32.totalorder %s4501_s15, %s3508_s30 }
  0x86   : > { %p3510_p1 = pnand %p3509_p0, %p3740_p3 }
  0x87   : > { %2671 = vmatmul.mubr.msk.f32.vlgmr.msra.gmra.mrb[0].mxu0 %vm518_vm0, %v490_v26 }
  0x88   : > { %601 = vmatprep.mubr.f32.mxu0 %v3616_v2  ;;  %p3511_p2 = pneg %p3510_p1 }
  0x8b   : > { %2672 = vmatmul.mubr.msk.f32.gmra.mrb[2].mxu0 %vm518_vm0, %v491_v27 }
  0x8c   : > { %607 = vmatprep.mubr.f32.mxu0 %v3616_v2 }
  0x8f   : > { %2673 = vmatmul.mubr.msk.f32.gmra.mrb[4].mxu0 %vm518_vm0, %v492_v28 }
  0x90   : > { %613 = vmatprep.mubr.f32.mxu0 %v3616_v2 }
  0x93   : > { %2674 = vmatmul.mubr.msk.f32.gmra.mrb[6].mxu0 %vm518_vm0, %v493_v29  ;;  %vm1910_vm0 = vcmask 56320  }
  0x94   : > { %937 = vmatprep.mubr.f32.mxu0 %v3616_v2 }
  0xfc   : > { %v501_v36 = vpop.permute.xlu0 %500 }
  0xfd   : > { %v511_v49 = vpop.permute.xlu1 %510 }
 0x100   : > { %v506_v43 = vpop.permute.xlu0 %505 }
 0x101   : > { %v516_v62 = vpop.permute.xlu1 %515 }
 0x15a   : > { %v597_v38 = vpop.f32.mrb[0].mxu0 }
 0x15b   : > { %v598_v39 = vadd.f32 %v597_v38, %v501_v36  ;;  %v599_v41 = vpop.f32.mrb[1].mxu0 }
 0x15c   : > { %v600_v42 = vadd.f32 %v599_v41, %v501_v36 }
 0x15d   : > { %v3908_v44 = vmul.f32 %v2669_v37, %v598_v39 }
 0x15e   : > { %v3910_v45 = vmul.f32 %v2670_v40, %v600_v42  ;;  %v603_v46 = vpop.f32.mrb[2].mxu0 }
 0x15f   : > { %v604_v47 = vadd.f32 %v603_v46, %v506_v43  ;;  %v605_v48 = vpop.f32.mrb[3].mxu0 }
 0x160   : > { %v606_v50 = vadd.f32 %v605_v48, %v506_v43  ;;  %v3100_v51 = vpack.i.bf16 %v3910_v45, %v3908_v44 }
 0x161   : > { %v3914_v52 = vmul.f32 %v2669_v37, %v604_v47 }
 0x162   : > { %v3916_v53 = vmul.f32 %v2670_v40, %v606_v50  ;;  %v609_v54 = vpop.f32.mrb[4].mxu0  ;;  %3101 = vrot.lane.b32.xlu0 %v3100_v51, %s3618_s0 }
 0x163   : > { %v610_v55 = vadd.f32 %v609_v54, %v511_v49  ;;  %v611_v56 = vpop.f32.mrb[5].mxu0  ;;  %v2869_v61 = vpack.c.bf16 %v3914_v52, %v3908_v44 }
 0x164   : > { %v612_v57 = vadd.f32 %v611_v56, %v511_v49  ;;  %v3105_v58 = vpack.i.bf16 %v3916_v53, %v3914_v52  ;;  %v2867_v59 = vpack.c.bf16 %v3916_v53, %v3910_v45 }
 0x165   : > { %v3923_v60 = vmul.f32 %v2669_v37, %v610_v55 }
 0x166   : > { %v3927_v63 = vmul.f32 %v2670_v40, %v612_v57  ;;  %v615_v0 = vpop.f32.mrb[6].mxu0  ;;  %3106 = vrot.lane.b32.xlu1 %v3105_v58, %s3618_s0  ;;  %2868 = vmatprep.subr.bf16.mxu1 %v2867_v59 }
 0x167   : > { %v616_v1 = vadd.f32 %v615_v0, %v516_v62  ;;  %v617_v3 = vpop.f32.mrb[7].mxu0  ;;  %2870 = vmatpush1.bf16.msra.mxu1 %v2869_v61 }
 0x168   : > { %v618_v4 = vadd.f32 %v617_v3, %v516_v62  ;;  %v3110_v5 = vpack.i.bf16 %v3927_v63, %v3923_v60  ;;  %v694_v3 = vld [vmem:[%s4563_s4] sm:$0xff] }
 0x169   : > { %v3932_v6 = vmul.f32 %v2669_v37, %v616_v1 }
 0x16a   : > { %v3934_v7 = vmul.f32 %v2670_v40, %v618_v4  ;;  %3111 = vrot.lane.b32.xlu0 %v3110_v5, %s3618_s0  ;;  %v695_v4 = vld [vmem:[%s4563_s4 + $0x8] sm:$0xff] }
 0x16b   : > { %v2873_v10 = vpack.c.bf16 %v3932_v6, %v3923_v60 }
 0x16c   : > { %v3120_v8 = vpack.i.bf16 %v3934_v7, %v3932_v6  ;;  %v2871_v9 = vpack.c.bf16 %v3934_v7, %v3927_v63 }
 0x16e   : > { %3121 = vrot.lane.b32.xlu1 %v3120_v8, %s3618_s0  ;;  %3116 = vrot.lane.b32.xlu0 %v3100_v51, %s3619_s27 }
 0x16f   : > { %2872 = vmatprep.subr.bf16.mxu1 %v2871_v9 }
 0x170   : > { %2874 = vmatpush1.bf16.msra.mxu1 %v2873_v10 }
 0x172   : > { %3126 = vrot.lane.b32.xlu1 %v3105_v58, %s3619_s27  ;;  %3131 = vrot.lane.b32.xlu0 %v3110_v5, %s3619_s27  ;;  %v696_v5 = vld [vmem:[%s4563_s4 + $0x10] sm:$0xff] }
 0x176   : > { %3136 = vrot.lane.b32.xlu1 %v3120_v8, %s3619_s27  ;;  %704 = vperm.xlu0 %3098, %v698_v11   ;;  %v697_v8 = vld [vmem:[%s4563_s4 + $0x18] sm:$0xff] }
 0x17a   : > { %709 = vperm.xlu1 %3099, %v699_v12   ;;  %714 = vperm.xlu0 %3098, %v700_v13  }
 0x17e   : > { %719 = vperm.xlu1 %3099, %v701_v14   ;;  %842 = vperm.xlu0 %3098, %v836_v15  }
 0x182   : > { %847 = vperm.xlu1 %3099, %v837_v16   ;;  %852 = vperm.xlu0 %3098, %v838_v17  }
 0x186   : > { %857 = vperm.xlu1 %3099, %v839_v18  }
 0x1d4   : > { %v3102_v19 = vpop.permute.xlu0 %3101 }
 0x1d5   : > { %v3104_v20 = vunpack.i.h.bf16 %v3102_v19  ;;  %v3103_v21 = vunpack.i.l.bf16 %v3102_v19 }
 0x1d7   : > { %v653_v26 = vsel %vm652_vm7, %v3103_v21, %v3104_v20 }
 0x1d8   : > { %v3107_v22 = vpop.permute.xlu1 %3106 }
 0x1d9   : > { %v3109_v23 = vunpack.i.h.bf16 %v3107_v22  ;;  %v3108_v24 = vunpack.i.l.bf16 %v3107_v22 }
 0x1db   : > { %v2875_v25 = vpack.c.bf16 %v3109_v23, %v3104_v20  ;;  %v654_v27 = vsel %vm652_vm7, %v3108_v24, %v3109_v23 }
 0x1dc   : > { %v3112_v28 = vpop.permute.xlu0 %3111  ;;  %v2877_v29 = vpack.c.bf16 %v654_v27, %v653_v26 }
 0x1dd   : > { %2876 = vmatprep.subr.bf16.mxu1 %v2875_v25  ;;  %v3114_v31 = vunpack.i.h.bf16 %v3112_v28  ;;  %v3113_v32 = vunpack.i.l.bf16 %v3112_v28 }
 0x1de   : > { %2878 = vmatpush1.bf16.msra.mxu1 %v2877_v29 }
 0x1df   : > { %v655_v40 = vsel %vm652_vm7, %v3113_v32, %v3114_v31 }
 0x1e0   : > { %v3122_v33 = vpop.permute.xlu1 %3121  ;;  %v3117_v34 = vpop.permute.xlu0 %3116 }
 0x1e1   : > { %v3124_v35 = vunpack.i.h.bf16 %v3122_v33  ;;  %v3123_v36 = vunpack.i.l.bf16 %v3122_v33  ;;  %v3119_v37 = vunpack.i.h.bf16 %v3117_v34  ;;  %v3118_v38 = vunpack.i.l.bf16 %v3117_v34 }
 0x1e3   : > { %v2879_v39 = vpack.c.bf16 %v3124_v35, %v3114_v31  ;;  %v656_v41 = vsel %vm652_vm7, %v3123_v36, %v3124_v35  ;;  %v682_v49 = vsel %vm681_vm8, %v3118_v38, %v3119_v37 }
 0x1e4   : > { %v3127_v42 = vpop.permute.xlu1 %3126  ;;  %v3132_v43 = vpop.permute.xlu0 %3131  ;;  %v2881_v46 = vpack.c.bf16 %v656_v41, %v655_v40 }
 0x1e5   : > { %v3129_v47 = vunpack.i.h.bf16 %v3127_v42  ;;  %v3128_v48 = vunpack.i.l.bf16 %v3127_v42  ;;  %2880 = vmatprep.subr.bf16.mxu1 %v2879_v39  ;;  %v3134_v50 = vunpack.i.h.bf16 %v3132_v43  ;;  %v3133_v51 = vunpack.i.l.bf16 %v3132_v43  ;;  %v832_v42 = vld [vmem:[%s4565_s6] sm:$0xff]  ;;  %v833_v43 = vld [vmem:[%s4565_s6 + $0x8] sm:$0xff] }
 0x1e6   : > { %2882 = vmatpush1.bf16.msra.mxu1 %v2881_v46  ;;  %v834_v46 = vld [vmem:[%s4565_s6 + $0x10] sm:$0xff] }
 0x1e7   : > { %v2883_v54 = vpack.c.bf16 %v3129_v47, %v3119_v37  ;;  %v683_v55 = vsel %vm681_vm8, %v3128_v48, %v3129_v47  ;;  %v684_v62 = vsel %vm681_vm8, %v3133_v51, %v3134_v50  ;;  %v835_v47 = vld [vmem:[%s4565_s6 + $0x18] sm:$0xff] }
 0x1e8   : > { %v3137_v56 = vpop.permute.xlu1 %3136  ;;  %v2885_v57 = vpack.c.bf16 %v683_v55, %v682_v49 }
 0x1e9   : > { %v3139_v58 = vunpack.i.h.bf16 %v3137_v56  ;;  %v3138_v59 = vunpack.i.l.bf16 %v3137_v56  ;;  %2884 = vmatprep.subr.bf16.mxu1 %v2883_v54 }
 0x1ea   : > { %2886 = vmatpush1.bf16.msra.mxu1 %v2885_v57 }
 0x1eb   : > { %v2887_v61 = vpack.c.bf16 %v3139_v58, %v3134_v50  ;;  %v685_v0 = vsel %vm681_vm8, %v3138_v59, %v3139_v58 }
 0x1ec   : > { %v2889_v1 = vpack.c.bf16 %v685_v0, %v684_v62 }
 0x1ed   : > { %2888 = vmatprep.subr.bf16.mxu1 %v2887_v61 }
 0x1ee   : > { %2890 = vmatpush1.bf16.msra.mxu1 %v2889_v1 }
 0x1f1   : > { %2675 = vmatmul.mubr.msk.f32.vlgmr.msra.gmra.mrb[0].mxu1 %vm722_vm9, %v694_v3 }
 0x1f2   : > { %805 = vmatprep.mubr.f32.mxu1 %v3616_v2 }
 0x1f5   : > { %2676 = vmatmul.mubr.msk.f32.gmra.mrb[2].mxu1 %vm722_vm9, %v695_v4  ;;  %v705_v11 = vpop.permute.xlu0 %704 }
 0x1f6   : > { %811 = vmatprep.mubr.f32.mxu1 %v3616_v2 }
 0x1f9   : > { %2677 = vmatmul.mubr.msk.f32.gmra.mrb[4].mxu1 %vm722_vm9, %v696_v5  ;;  %v710_v13 = vpop.permute.xlu1 %709  ;;  %v715_v26 = vpop.permute.xlu0 %714 }
 0x1fa   : > { %817 = vmatprep.mubr.f32.mxu1 %v3616_v2 }
 0x1fd   : > { %2678 = vmatmul.mubr.msk.f32.gmra.mrb[6].mxu1 %vm722_vm9, %v697_v8  ;;  %v720_v29 = vpop.permute.xlu1 %719  ;;  %v843_v48 = vpop.permute.xlu0 %842 }
 0x1fe   : > { %1265 = vmatprep.mubr.f32.mxu1 %v3616_v2 }
 0x201   : > { %v848_v55 = vpop.permute.xlu1 %847  ;;  %v853_v61 = vpop.permute.xlu0 %852 }
 0x205   : > { %v858_v4 = vpop.permute.xlu1 %857 }
 0x2c4   : > { %v801_v9 = vpop.f32.mrb[0].mxu1 }
 0x2c5   : > { %v803_v10 = vpop.f32.mrb[1].mxu1  ;;  %v802_v12 = vadd.f32 %v801_v9, %v705_v11 }
 0x2c6   : > { %v804_v14 = vadd.f32 %v803_v10, %v705_v11  ;;  %v1009_v11 = vshrl.u32 %v474_v30, 7 }
 0x2c7   : > { %v824_v19 = vmax.f32 %v802_v12, 0.0 }
 0x2c8   : > { %v807_v15 = vpop.f32.mrb[2].mxu1  ;;  %v825_v21 = vmax.f32 %v804_v14, 0.0  ;;  %v1010_v12 = vsub.s32 0, %v1009_v11  ;;  %v473_v14 = vld [vmem:[%s3859_s22] sm:$0x3]  ;;  %s3621_s22 = smov 124  }
 0x2c9   : > { %v808_v16 = vadd.f32 %v807_v15, %v710_v13  ;;  %v809_v17 = vpop.f32.mrb[3].mxu1 }
 0x2ca   : > { %v810_v18 = vadd.f32 %v809_v17, %v710_v13  ;;  %v1014_v13 = vsub.s32 1, %v1009_v11 }
 0x2cb   : > { %v826_v20 = vmax.f32 %v808_v16, 0.0  ;;  %v4022_v16 = vrot.slane %v473_v14, %v1010_v12 }
 0x2cc   : > { %v827_v22 = vmax.f32 %v810_v18, 0.0  ;;  %v813_v23 = vpop.f32.mrb[4].mxu1  ;;  %v4024_v17 = vrot.slane %v473_v14, %v1014_v13 }
 0x2cd   : > { %v2893_v24 = vpack.c.bf16 %v826_v20, %v824_v19  ;;  %v815_v25 = vpop.f32.mrb[5].mxu1  ;;  %v814_v28 = vadd.f32 %v813_v23, %v715_v26 }
 0x2ce   : > { %v2891_v27 = vpack.c.bf16 %v827_v22, %v825_v21  ;;  %v816_v31 = vadd.f32 %v815_v25, %v715_v26 }
 0x2cf   : > { %v828_v36 = vmax.f32 %v814_v28, 0.0 }
 0x2d0   : > { %v819_v32 = vpop.f32.mrb[6].mxu1  ;;  %2892 = vmatprep.subr.bf16.mxu0 %v2891_v27  ;;  %v829_v38 = vmax.f32 %v816_v31, 0.0 }
 0x2d1   : > { %v820_v33 = vadd.f32 %v819_v32, %v720_v29  ;;  %v821_v34 = vpop.f32.mrb[7].mxu1  ;;  %2894 = vmatpush1.bf16.msra.mxu0 %v2893_v24 }
 0x2d2   : > { %v822_v35 = vadd.f32 %v821_v34, %v720_v29 }
 0x2d3   : > { %v830_v37 = vmax.f32 %v820_v33, 0.0 }
 0x2d4   : > { %v831_v39 = vmax.f32 %v822_v35, 0.0 }
 0x2d5   : > { %v2897_v40 = vpack.c.bf16 %v830_v37, %v828_v36 }
 0x2d6   : > { %v2895_v41 = vpack.c.bf16 %v831_v39, %v829_v38 }
 0x2d8   : > { %2896 = vmatprep.subr.bf16.mxu0 %v2895_v41 }
 0x2d9   : > { %2898 = vmatpush1.bf16.msra.mxu0 %v2897_v40 }
 0x2dc   : > { %2679 = vmatmul.mubr.msk.f32.vlgmr.msra.gmra.mrb[8].mxu0 %vm860_vm10, %v832_v42 }
 0x2dd   : > { %943 = vmatprep.mubr.f32.mxu0 %v3616_v2 }
 0x2e0   : > { %2680 = vmatmul.mubr.msk.f32.gmra.mrb[10].mxu0 %vm860_vm10, %v833_v43 }
 0x2e1   : > { %949 = vmatprep.mubr.f32.mxu0 %v3616_v2 }
 0x2e4   : > { %2681 = vmatmul.mubr.msk.f32.gmra.mrb[12].mxu0 %vm860_vm10, %v834_v46 }
 0x2e5   : > { %955 = vmatprep.mubr.f32.mxu0 %v3616_v2 }
 0x2e8   : > { %2682 = vmatmul.mubr.msk.f32.gmra.mrb[14].mxu0 %vm860_vm10, %v835_v47 }
 0x2e9   : > { %1404 = vmatprep.mubr.f32.mxu0 %v3616_v2 }
 0x3af   : > { %v939_v49 = vpop.f32.mrb[8].mxu0 }
 0x3b0   : > { %v940_v50 = vadd.f32 %v939_v49, %v843_v48  ;;  %v941_v51 = vpop.f32.mrb[9].mxu0 }
 0x3b1   : > { %v942_v54 = vadd.f32 %v941_v51, %v843_v48 }
 0x3b2   : > { %970 = vrot.lane.b32.xlu0 %v940_v50, %s3620_s21 }
 0x3b3   : > { %v945_v56 = vpop.f32.mrb[10].mxu0  ;;  %972 = vrot.lane.b32.xlu1 %v942_v54, %s3620_s21 }
 0x3b4   : > { %v946_v57 = vadd.f32 %v945_v56, %v848_v55  ;;  %v947_v58 = vpop.f32.mrb[11].mxu0 }
 0x3b5   : > { %v948_v59 = vadd.f32 %v947_v58, %v848_v55 }
 0x3b6   : > { %974 = vrot.lane.b32.xlu0 %v946_v57, %s3620_s21 }
 0x3b7   : > { %v951_v62 = vpop.f32.mrb[12].mxu0  ;;  %976 = vrot.lane.b32.xlu1 %v948_v59, %s3620_s21 }
 0x3b8   : > { %v952_v0 = vadd.f32 %v951_v62, %v853_v61  ;;  %v953_v1 = vpop.f32.mrb[13].mxu0 }
 0x3b9   : > { %v954_v3 = vadd.f32 %v953_v1, %v853_v61 }
 0x3ba   : > { %978 = vrot.lane.b32.xlu0 %v952_v0, %s3620_s21 }
 0x3bb   : > { %v957_v5 = vpop.f32.mrb[14].mxu0  ;;  %980 = vrot.lane.b32.xlu1 %v954_v3, %s3620_s21 }
 0x3bc   : > { %v958_v8 = vadd.f32 %v957_v5, %v858_v4  ;;  %v959_v9 = vpop.f32.mrb[15].mxu0 }
 0x3bd   : > { %v960_v10 = vadd.f32 %v959_v9, %v858_v4 }
 0x3be   : > { %982 = vrot.lane.b32.xlu0 %v958_v8, %s3620_s21 }
 0x3bf   : > { %984 = vrot.lane.b32.xlu1 %v960_v10, %s3620_s21 }
 0x424   : > { %v971_v15 = vpop.permute.xlu0 %970 }
 0x425   : > { %v999_v18 = vadd.f32 %v971_v15, %v3908_v44  ;;  %v973_v19 = vpop.permute.xlu1 %972 }
 0x426   : > { %v987_v20 = vsel %vm986_vm11, %v971_v15, %v973_v19 }
 0x427   : > { %v1000_v21 = vadd.f32 %v987_v20, %v3910_v45  ;;  %v4030_v23 = vmul.f32 %v4022_v16, %v999_v18 }
 0x428   : > { %v975_v22 = vpop.permute.xlu0 %974 }
 0x429   : > { %v4033_v30 = vmul.f32 %v4024_v17, %v1000_v21  ;;  %v1001_v24 = vadd.f32 %v975_v22, %v3914_v52  ;;  %v977_v25 = vpop.permute.xlu1 %976 }
 0x42a   : > { %v988_v26 = vsel %vm986_vm11, %v975_v22, %v977_v25 }
 0x42b   : > { %v1002_v27 = vadd.f32 %v988_v26, %v3916_v53  ;;  %v3140_v44 = vpack.i.bf16 %v4033_v30, %v4030_v23  ;;  %v4041_v45 = vmul.f32 %v4022_v16, %v1001_v24 }
 0x42c   : > { %v979_v28 = vpop.permute.xlu0 %978 }
 0x42d   : > { %v4044_v29 = vmul.f32 %v4024_v17, %v1002_v27  ;;  %v1003_v31 = vadd.f32 %v979_v28, %v3923_v60  ;;  %v981_v32 = vpop.permute.xlu1 %980  ;;  %3141 = vrot.lane.b32.xlu0 %v3140_v44, %s3619_s27 }
 0x42e   : > { %v989_v52 = vsel %vm986_vm11, %v979_v28, %v981_v32  ;;  %v2687_v32 = vld [vmem:[%s4564_s5 + $0x20] sm:$0xff] }
 0x42f   : > { %v1004_v33 = vadd.f32 %v989_v52, %v3927_v63  ;;  %v3145_v53 = vpack.i.bf16 %v4044_v29, %v4041_v45  ;;  %v4053_v35 = vmul.f32 %v4022_v16, %v1003_v31 }
 0x430   : > { %v983_v34 = vpop.permute.xlu0 %982 }
 0x431   : > { %v4056_v36 = vmul.f32 %v4024_v17, %v1004_v33  ;;  %v1005_v37 = vadd.f32 %v983_v34, %v3932_v6  ;;  %v985_v60 = vpop.permute.xlu1 %984  ;;  %3146 = vrot.lane.b32.xlu1 %v3145_v53, %s3619_s27 }
 0x432   : > { %v990_v38 = vsel %vm986_vm11, %v983_v34, %v985_v60 }
 0x433   : > { %v1006_v39 = vadd.f32 %v990_v38, %v3934_v7  ;;  %v3150_v63 = vpack.i.bf16 %v4056_v36, %v4053_v35  ;;  %v4065_v40 = vmul.f32 %v4022_v16, %v1005_v37 }
 0x435   : > { %v4068_v41 = vmul.f32 %v4024_v17, %v1006_v39  ;;  %3151 = vrot.lane.b32.xlu0 %v3150_v63, %s3619_s27 }
 0x437   : > { %v3160_v6 = vpack.i.bf16 %v4068_v41, %v4065_v40 }
 0x439   : > { %3156 = vrot.lane.b32.xlu0 %v3140_v44, %s3621_s22  ;;  %3161 = vrot.lane.b32.xlu1 %v3160_v6, %s3619_s27  ;;  %s3003_s27 = smul.u32 6, %s3594_s17  ;;  %s4603_s17 = sld [smem:[#allocation26_spill]] }
 0x43b   : > { %s2501_s24 = sadd.s32 %s3590_s16, %s3003_s27  ;;  %s4605_s16 = sand.u32 1, %s4601_s19  }
 0x43c   : > { %s2758_s11 = sshll.u32 %s2501_s24, 7  ;;  %s4507_s12 = scalar_lea.sflag [#allocation6], %s4605_s16 }
 0x43d   : > { %3171 = vrot.lane.b32.xlu0 %v3150_v63, %s3621_s22  ;;  %3166 = vrot.lane.b32.xlu1 %v3145_v53, %s3621_s22 }
 0x43f   : > { %s4499_s20 = scalar_lea.hbm %s4603_s17, %s2758_s11 }
 0x441   : > { %3181 = vrot.lane.b32.xlu0 %v3140_v44, %s3618_s0  ;;  %3176 = vrot.lane.b32.xlu1 %v3160_v6, %s3621_s22 }
 0x445   : > { %3191 = vrot.lane.b32.xlu0 %v3150_v63, %s3618_s0  ;;  %3186 = vrot.lane.b32.xlu1 %v3145_v53, %s3618_s0 }
 0x449   : > { %3196 = vrot.lane.b32.xlu1 %v3160_v6, %s3618_s0 }
 0x49f   : > { %v3142_v7 = vpop.permute.xlu0 %3141 }
 0x4a0   : > { %v3144_v42 = vunpack.i.h.bf16 %v3142_v7  ;;  %v3143_v43 = vunpack.i.l.bf16 %v3142_v7  ;;  %v2688_v7 = vld [vmem:[%s4564_s5 + $0x28] sm:$0xff] }
 0x4a2   : > { %v1050_v46 = vsel %vm681_vm8, %v3143_v43, %v3144_v42 }
 0x4a3   : > { %v3147_v47 = vpop.permute.xlu1 %3146  ;;  %v3200_v48 = vpack.i.bf16 %v3144_v42, %v1050_v46  ;;  %v2689_v46 = vld [vmem:[%s4564_s5 + $0x30] sm:$0xff] }
 0x4a4   : > { %v3149_v49 = vunpack.i.h.bf16 %v3147_v47  ;;  %v3148_v50 = vunpack.i.l.bf16 %v3147_v47 }
 0x4a5   : > { %3201 = vrot.lane.b32.xlu0 %v3200_v48, %s3618_s0 }
 0x4a6   : > { %v1051_v51 = vsel %vm681_vm8, %v3148_v50, %v3149_v49 }
 0x4a7   : > { %v3152_v54 = vpop.permute.xlu0 %3151  ;;  %v3205_v55 = vpack.i.bf16 %v3149_v49, %v1051_v51 }
 0x4a8   : > { %v3154_v56 = vunpack.i.h.bf16 %v3152_v54  ;;  %v3153_v57 = vunpack.i.l.bf16 %v3152_v54  ;;  %v2690_v54 = vld [vmem:[%s4564_s5 + $0x38] sm:$0xff] }
 0x4a9   : > { %3206 = vrot.lane.b32.xlu1 %v3205_v55, %s3618_s0 }
 0x4aa   : > { %v1052_v58 = vsel %vm681_vm8, %v3153_v57, %v3154_v56  ;;  %v2700_v57 = vld [vmem:[%s4566_s7 + $0x28] sm:$0xff] }
 0x4ab   : > { %v3162_v59 = vpop.permute.xlu1 %3161  ;;  %v3157_v61 = vpop.permute.xlu0 %3156  ;;  %v3210_v62 = vpack.i.bf16 %v3154_v56, %v1052_v58  ;;  %v2699_v56 = vld [vmem:[%s4566_s7 + $0x20] sm:$0xff]  ;;  %v2701_v58 = vld [vmem:[%s4566_s7 + $0x30] sm:$0xff] }
 0x4ac   : > { %v3164_v0 = vunpack.i.h.bf16 %v3162_v59  ;;  %v3163_v1 = vunpack.i.l.bf16 %v3162_v59  ;;  %v3159_v3 = vunpack.i.h.bf16 %v3157_v61  ;;  %v3158_v4 = vunpack.i.l.bf16 %v3157_v61  ;;  %v2702_v59 = vld [vmem:[%s4566_s7 + $0x38] sm:$0xff] }
 0x4ad   : > { %3211 = vrot.lane.b32.xlu0 %v3210_v62, %s3618_s0 }
 0x4ae   : > { %v1053_v5 = vsel %vm681_vm8, %v3163_v1, %v3164_v0  ;;  %v1071_v8 = vsel %vm1070_vm12, %v3158_v4, %v3159_v3 }
 0x4af   : > { %v3167_v9 = vpop.permute.xlu1 %3166  ;;  %v3172_v10 = vpop.permute.xlu0 %3171  ;;  %v3220_v11 = vpack.i.bf16 %v3164_v0, %v1053_v5  ;;  %v3215_v12 = vpack.i.bf16 %v3159_v3, %v1071_v8 }
 0x4b0   : > { %v3169_v13 = vunpack.i.h.bf16 %v3167_v9  ;;  %v3168_v14 = vunpack.i.l.bf16 %v3167_v9  ;;  %v3174_v15 = vunpack.i.h.bf16 %v3172_v10  ;;  %v3173_v18 = vunpack.i.l.bf16 %v3172_v10 }
 0x4b1   : > { %3221 = vrot.lane.b32.xlu1 %v3220_v11, %s3618_s0  ;;  %3216 = vrot.lane.b32.xlu0 %v3215_v12, %s3618_s0 }
 0x4b2   : > { %v1072_v19 = vsel %vm1070_vm12, %v3168_v14, %v3169_v13  ;;  %v1073_v20 = vsel %vm1070_vm12, %v3173_v18, %v3174_v15 }
 0x4b3   : > { %v3177_v21 = vpop.permute.xlu1 %3176  ;;  %v3182_v22 = vpop.permute.xlu0 %3181  ;;  %v3225_v24 = vpack.i.bf16 %v3169_v13, %v1072_v19  ;;  %v3230_v25 = vpack.i.bf16 %v3174_v15, %v1073_v20 }
 0x4b4   : > { %v3179_v26 = vunpack.i.h.bf16 %v3177_v21  ;;  %v3178_v27 = vunpack.i.l.bf16 %v3177_v21  ;;  %v3184_v44 = vunpack.i.h.bf16 %v3182_v22  ;;  %v3183_v28 = vunpack.i.l.bf16 %v3182_v22 }
 0x4b5   : > { %3226 = vrot.lane.b32.xlu1 %v3225_v24, %s3618_s0  ;;  %3231 = vrot.lane.b32.xlu0 %v3230_v25, %s3618_s0 }
 0x4b6   : > { %v1074_v31 = vsel %vm1070_vm12, %v3178_v27, %v3179_v26  ;;  %v1153_v60 = vsel %vm652_vm7, %v3183_v28, %v3184_v44 }
 0x4b7   : > { %v3187_v52 = vpop.permute.xlu1 %3186  ;;  %v3192_v33 = vpop.permute.xlu0 %3191  ;;  %v3235_v53 = vpack.i.bf16 %v3179_v26, %v1074_v31 }
 0x4b8   : > { %v3189_v34 = vunpack.i.h.bf16 %v3187_v52  ;;  %v3188_v37 = vunpack.i.l.bf16 %v3187_v52  ;;  %v3194_v39 = vunpack.i.h.bf16 %v3192_v33  ;;  %v3193_v63 = vunpack.i.l.bf16 %v3192_v33 }
 0x4b9   : > { %3236 = vrot.lane.b32.xlu1 %v3235_v53, %s3618_s0  ;;  %1087 = vperm.xlu0 %3098, %v2687_v32  }
 0x4ba   : > { %v1154_v38 = vsel %vm652_vm7, %v3188_v37, %v3189_v34  ;;  %v2899_v6 = vpack.c.bf16 %v3189_v34, %v3184_v44  ;;  %v1155_v49 = vsel %vm652_vm7, %v3193_v63, %v3194_v39 }
 0x4bb   : > { %v3197_v42 = vpop.permute.xlu1 %3196  ;;  %v2901_v43 = vpack.c.bf16 %v1154_v38, %v1153_v60 }
 0x4bc   : > { %v3199_v47 = vunpack.i.h.bf16 %v3197_v42  ;;  %v3198_v48 = vunpack.i.l.bf16 %v3197_v42  ;;  %2900 = vmatprep.subr.bf16.mxu1 %v2899_v6 }
 0x4bd   : > { %1092 = vperm.xlu1 %3099, %v2688_v7   ;;  %2902 = vmatpush1.bf16.msra.mxu1 %v2901_v43  ;;  %v2683_v43 = vld [vmem:[%s4563_s4 + $0x20] sm:$0xff] }
 0x4be   : > { %v1156_v50 = vsel %vm652_vm7, %v3198_v48, %v3199_v47  ;;  %1097 = vperm.xlu0 %3098, %v2689_v46   ;;  %v2903_v51 = vpack.c.bf16 %v3199_v47, %v3194_v39  ;;  %v2684_v46 = vld [vmem:[%s4563_s4 + $0x28] sm:$0xff]  ;;  %v2685_v47 = vld [vmem:[%s4563_s4 + $0x30] sm:$0xff]  ;;  %v2686_v48 = vld [vmem:[%s4563_s4 + $0x38] sm:$0xff] }
 0x4bf   : > { %v2905_v55 = vpack.c.bf16 %v1156_v50, %v1155_v49 }
 0x4c0   : > { %2904 = vmatprep.subr.bf16.mxu1 %v2903_v51 }
 0x4c1   : > { %1102 = vperm.xlu1 %3099, %v2690_v54   ;;  %2906 = vmatpush1.bf16.msra.mxu1 %v2905_v55 }
 0x4c2   : > { %1310 = vperm.xlu0 %3098, %v2699_v56  }
 0x4c5   : > { %1315 = vperm.xlu1 %3099, %v2700_v57  }
 0x4c6   : > { %1320 = vperm.xlu0 %3098, %v2701_v58  }
 0x4c9   : > { %1325 = vperm.xlu1 %3099, %v2702_v59  }
 0x517   : > { %v3202_v61 = vpop.permute.xlu0 %3201 }
 0x518   : > { %v3204_v62 = vunpack.i.h.bf16 %v3202_v61  ;;  %v3203_v0 = vunpack.i.l.bf16 %v3202_v61 }
 0x51a   : > { %v1157_v5 = vsel %vm652_vm7, %v3203_v0, %v3204_v62 }
 0x51b   : > { %v3207_v1 = vpop.permute.xlu1 %3206 }
 0x51c   : > { %v3209_v3 = vunpack.i.h.bf16 %v3207_v1  ;;  %v3208_v4 = vunpack.i.l.bf16 %v3207_v1 }
 0x51e   : > { %v1158_v8 = vsel %vm652_vm7, %v3208_v4, %v3209_v3  ;;  %v2907_v9 = vpack.c.bf16 %v3209_v3, %v3204_v62 }
 0x51f   : > { %v3212_v10 = vpop.permute.xlu0 %3211  ;;  %v2909_v11 = vpack.c.bf16 %v1158_v8, %v1157_v5 }
 0x520   : > { %2908 = vmatprep.subr.bf16.mxu1 %v2907_v9  ;;  %v3214_v12 = vunpack.i.h.bf16 %v3212_v10  ;;  %v3213_v13 = vunpack.i.l.bf16 %v3212_v10 }
 0x521   : > { %2910 = vmatpush1.bf16.msra.mxu1 %v2909_v11 }
 0x522   : > { %v1159_v22 = vsel %vm652_vm7, %v3213_v13, %v3214_v12 }
 0x523   : > { %v3222_v14 = vpop.permute.xlu1 %3221  ;;  %v3217_v15 = vpop.permute.xlu0 %3216 }
 0x524   : > { %v3224_v18 = vunpack.i.h.bf16 %v3222_v14  ;;  %v3223_v19 = vunpack.i.l.bf16 %v3222_v14  ;;  %v3219_v20 = vunpack.i.h.bf16 %v3217_v15  ;;  %v3218_v21 = vunpack.i.l.bf16 %v3217_v15 }
 0x526   : > { %v1160_v24 = vsel %vm652_vm7, %v3223_v19, %v3224_v18  ;;  %v2911_v25 = vpack.c.bf16 %v3224_v18, %v3214_v12  ;;  %v1161_v32 = vsel %vm652_vm7, %v3218_v21, %v3219_v20 }
 0x527   : > { %v2913_v26 = vpack.c.bf16 %v1160_v24, %v1159_v22  ;;  %v3227_v27 = vpop.permute.xlu1 %3226  ;;  %v3232_v44 = vpop.permute.xlu0 %3231 }
 0x528   : > { %v3229_v28 = vunpack.i.h.bf16 %v3227_v27  ;;  %v3228_v31 = vunpack.i.l.bf16 %v3227_v27  ;;  %2912 = vmatprep.subr.bf16.mxu1 %v2911_v25  ;;  %v3234_v53 = vunpack.i.h.bf16 %v3232_v44  ;;  %v3233_v34 = vunpack.i.l.bf16 %v3232_v44  ;;  %v2695_v27 = vld [vmem:[%s4565_s6 + $0x20] sm:$0xff]  ;;  %v2696_v44 = vld [vmem:[%s4565_s6 + $0x28] sm:$0xff] }
 0x529   : > { %2914 = vmatpush1.bf16.msra.mxu1 %v2913_v26 }
 0x52a   : > { %v1162_v52 = vsel %vm652_vm7, %v3228_v31, %v3229_v28  ;;  %v2915_v33 = vpack.c.bf16 %v3229_v28, %v3219_v20  ;;  %v1163_v63 = vsel %vm652_vm7, %v3233_v34, %v3234_v53  ;;  %v2697_v28 = vld [vmem:[%s4565_s6 + $0x30] sm:$0xff]  ;;  %v2698_v31 = vld [vmem:[%s4565_s6 + $0x38] sm:$0xff] }
 0x52b   : > { %v2917_v37 = vpack.c.bf16 %v1162_v52, %v1161_v32  ;;  %v3237_v60 = vpop.permute.xlu1 %3236 }
 0x52c   : > { %v3239_v38 = vunpack.i.h.bf16 %v3237_v60  ;;  %v3238_v39 = vunpack.i.l.bf16 %v3237_v60  ;;  %2916 = vmatprep.subr.bf16.mxu1 %v2915_v33 }
 0x52d   : > { %2918 = vmatpush1.bf16.msra.mxu1 %v2917_v37 }
 0x52e   : > { %v1164_v6 = vsel %vm652_vm7, %v3238_v39, %v3239_v38  ;;  %v2919_v7 = vpack.c.bf16 %v3239_v38, %v3234_v53 }
 0x52f   : > { %v2921_v42 = vpack.c.bf16 %v1164_v6, %v1163_v63 }
 0x530   : > { %2920 = vmatprep.subr.bf16.mxu1 %v2919_v7 }
 0x531   : > { %2922 = vmatpush1.bf16.msra.mxu1 %v2921_v42 }
 0x534   : > { %2691 = vmatmul.mubr.msk.f32.vlgmr.msra.gmra.mrb[8].mxu1 %vm722_vm9, %v2683_v43 }
 0x535   : > { %1271 = vmatprep.mubr.f32.mxu1 %v3616_v2 }
 0x538   : > { %2692 = vmatmul.mubr.msk.f32.gmra.mrb[10].mxu1 %vm722_vm9, %v2684_v46  ;;  %v1088_v51 = vpop.permute.xlu0 %1087 }
 0x539   : > { %1277 = vmatprep.mubr.f32.mxu1 %v3616_v2 }
 0x53c   : > { %2693 = vmatmul.mubr.msk.f32.gmra.mrb[12].mxu1 %vm722_vm9, %v2685_v47  ;;  %v1093_v55 = vpop.permute.xlu1 %1092 }
 0x53d   : > { %1283 = vmatprep.mubr.f32.mxu1 %v3616_v2  ;;  %v1098_v9 = vpop.permute.xlu0 %1097 }
 0x540   : > { %2694 = vmatmul.mubr.msk.f32.gmra.mrb[14].mxu1 %vm722_vm9, %v2686_v48  ;;  %v1103_v12 = vpop.permute.xlu1 %1102 }
 0x541   : > { %1861 = vmatprep.mubr.f32.mxu1 %v3616_v2  ;;  %v1311_v32 = vpop.permute.xlu0 %1310 }
 0x544   : > { %v1316_v37 = vpop.permute.xlu1 %1315 }
 0x545   : > { %v1321_v6 = vpop.permute.xlu0 %1320 }
 0x548   : > { %v1326_v47 = vpop.permute.xlu1 %1325 }
 0x607   : > { %v1267_v49 = vpop.f32.mrb[8].mxu1 }
 0x608   : > { %v1269_v50 = vpop.f32.mrb[9].mxu1  ;;  %v1268_v54 = vadd.f32 %v1267_v49, %v1088_v51 }
 0x609   : > { %v1270_v56 = vadd.f32 %v1269_v50, %v1088_v51 }
 0x60a   : > { %v1290_v62 = vmax.f32 %v1268_v54, 0.0 }
 0x60b   : > { %v1273_v57 = vpop.f32.mrb[10].mxu1  ;;  %v1291_v1 = vmax.f32 %v1270_v56, 0.0 }
 0x60c   : > { %v1274_v58 = vadd.f32 %v1273_v57, %v1093_v55  ;;  %v1275_v59 = vpop.f32.mrb[11].mxu1 }
 0x60d   : > { %v1276_v61 = vadd.f32 %v1275_v59, %v1093_v55 }
 0x60e   : > { %v1292_v0 = vmax.f32 %v1274_v58, 0.0 }
 0x60f   : > { %v1293_v3 = vmax.f32 %v1276_v61, 0.0  ;;  %v1279_v4 = vpop.f32.mrb[12].mxu1 }
 0x610   : > { %v2925_v5 = vpack.c.bf16 %v1292_v0, %v1290_v62  ;;  %v1281_v8 = vpop.f32.mrb[13].mxu1  ;;  %v1280_v11 = vadd.f32 %v1279_v4, %v1098_v9 }
 0x611   : > { %v2923_v10 = vpack.c.bf16 %v1293_v3, %v1291_v1  ;;  %v1282_v13 = vadd.f32 %v1281_v8, %v1098_v9 }
 0x612   : > { %v1294_v20 = vmax.f32 %v1280_v11, 0.0 }
 0x613   : > { %v1285_v14 = vpop.f32.mrb[14].mxu1  ;;  %2924 = vmatprep.subr.bf16.mxu0 %v2923_v10  ;;  %v1295_v22 = vmax.f32 %v1282_v13, 0.0 }
 0x614   : > { %v1286_v15 = vadd.f32 %v1285_v14, %v1103_v12  ;;  %v1287_v18 = vpop.f32.mrb[15].mxu1  ;;  %2926 = vmatpush1.bf16.msra.mxu0 %v2925_v5 }
 0x615   : > { %v1288_v19 = vadd.f32 %v1287_v18, %v1103_v12 }
 0x616   : > { %v1296_v21 = vmax.f32 %v1286_v15, 0.0 }
 0x617   : > { %v1297_v24 = vmax.f32 %v1288_v19, 0.0 }
 0x618   : > { %v2929_v25 = vpack.c.bf16 %v1296_v21, %v1294_v20 }
 0x619   : > { %v2927_v26 = vpack.c.bf16 %v1297_v24, %v1295_v22 }
 0x61b   : > { %2928 = vmatprep.subr.bf16.mxu0 %v2927_v26 }
 0x61c   : > { %2930 = vmatpush1.bf16.msra.mxu0 %v2929_v25 }
 0x61f   : > { %2703 = vmatmul.mubr.msk.f32.vlgmr.msra.gmra.mrb[16].mxu0 %vm860_vm10, %v2695_v27 }
 0x620   : > { %1410 = vmatprep.mubr.f32.mxu0 %v3616_v2 }
 0x623   : > { %2704 = vmatmul.mubr.msk.f32.gmra.mrb[18].mxu0 %vm860_vm10, %v2696_v44 }
 0x624   : > { %1416 = vmatprep.mubr.f32.mxu0 %v3616_v2 }
 0x627   : > { %2705 = vmatmul.mubr.msk.f32.gmra.mrb[20].mxu0 %vm860_vm10, %v2697_v28 }
 0x628   : > { %1422 = vmatprep.mubr.f32.mxu0 %v3616_v2 }
 0x62b   : > { %2706 = vmatmul.mubr.msk.f32.gmra.mrb[22].mxu0 %vm860_vm10, %v2698_v31 }
 0x62c   : > { %1722 = vmatprep.mubr.f32.mxu0 %v3616_v2 }
 0x6f2   : > { %v1406_v52 = vpop.f32.mrb[16].mxu0 }
 0x6f3   : > { %v1407_v33 = vadd.f32 %v1406_v52, %v1311_v32  ;;  %v1408_v53 = vpop.f32.mrb[17].mxu0 }
 0x6f4   : > { %v1409_v34 = vadd.f32 %v1408_v53, %v1311_v32 }
 0x6f5   : > { %1437 = vrot.lane.b32.xlu0 %v1407_v33, %s3622_s28 }
 0x6f6   : > { %v1412_v60 = vpop.f32.mrb[18].mxu0  ;;  %1439 = vrot.lane.b32.xlu1 %v1409_v34, %s3622_s28 }
 0x6f7   : > { %v1413_v38 = vadd.f32 %v1412_v60, %v1316_v37  ;;  %v1414_v39 = vpop.f32.mrb[19].mxu0 }
 0x6f8   : > { %v1415_v63 = vadd.f32 %v1414_v39, %v1316_v37 }
 0x6f9   : > { %1441 = vrot.lane.b32.xlu0 %v1413_v38, %s3622_s28 }
 0x6fa   : > { %v1418_v7 = vpop.f32.mrb[20].mxu0  ;;  %1443 = vrot.lane.b32.xlu1 %v1415_v63, %s3622_s28 }
 0x6fb   : > { %v1419_v42 = vadd.f32 %v1418_v7, %v1321_v6  ;;  %v1420_v43 = vpop.f32.mrb[21].mxu0 }
 0x6fc   : > { %v1421_v46 = vadd.f32 %v1420_v43, %v1321_v6 }
 0x6fd   : > { %1445 = vrot.lane.b32.xlu0 %v1419_v42, %s3622_s28 }
 0x6fe   : > { %v1424_v48 = vpop.f32.mrb[22].mxu0  ;;  %1447 = vrot.lane.b32.xlu1 %v1421_v46, %s3622_s28 }
 0x6ff   : > { %v1425_v49 = vadd.f32 %v1424_v48, %v1326_v47  ;;  %v1426_v50 = vpop.f32.mrb[23].mxu0 }
 0x700   : > { %v1427_v51 = vadd.f32 %v1426_v50, %v1326_v47 }
 0x701   : > { %1449 = vrot.lane.b32.xlu0 %v1425_v49, %s3622_s28 }
 0x702   : > { %1451 = vrot.lane.b32.xlu1 %v1427_v51, %s3622_s28  ;;  %s3627_s28 = smov 121  }
 0x767   : > { %v1438_v54 = vpop.permute.xlu0 %1437 }
 0x768   : > { %v1466_v55 = vadd.f32 %v1438_v54, %v4030_v23  ;;  %v1440_v56 = vpop.permute.xlu1 %1439 }
 0x769   : > { %v1454_v57 = vsel %vm1453_vm13, %v1438_v54, %v1440_v56 }
 0x76a   : > { %v1467_v58 = vadd.f32 %v1454_v57, %v4033_v30  ;;  %v4178_v61 = vmul.f32 %v1466_v55, %v4022_v16 }
 0x76b   : > { %v1442_v59 = vpop.permute.xlu0 %1441 }
 0x76c   : > { %v4181_v62 = vmul.f32 %v1467_v58, %v4024_v17  ;;  %v1468_v0 = vadd.f32 %v1442_v59, %v4041_v45  ;;  %v1444_v1 = vpop.permute.xlu1 %1443 }
 0x76d   : > { %v1455_v3 = vsel %vm1453_vm13, %v1442_v59, %v1444_v1 }
 0x76e   : > { %v1469_v4 = vadd.f32 %v1455_v3, %v4044_v29  ;;  %v3240_v23 = vpack.i.bf16 %v4181_v62, %v4178_v61  ;;  %v4189_v30 = vmul.f32 %v1468_v0, %v4022_v16 }
 0x76f   : > { %v1446_v5 = vpop.permute.xlu0 %1445 }
 0x770   : > { %v4192_v8 = vmul.f32 %v1469_v4, %v4024_v17  ;;  %v1470_v9 = vadd.f32 %v1446_v5, %v4053_v35  ;;  %v1448_v10 = vpop.permute.xlu1 %1447  ;;  %3241 = vrot.lane.b32.xlu0 %v3240_v23, %s3621_s22 }
 0x771   : > { %v1456_v45 = vsel %vm1453_vm13, %v1446_v5, %v1448_v10  ;;  %v2711_v10 = vld [vmem:[%s4564_s5 + $0x40] sm:$0xff] }
 0x772   : > { %v1471_v11 = vadd.f32 %v1456_v45, %v4056_v36  ;;  %v3245_v29 = vpack.i.bf16 %v4192_v8, %v4189_v30  ;;  %v4201_v13 = vmul.f32 %v1470_v9, %v4022_v16 }
 0x773   : > { %v1450_v12 = vpop.permute.xlu0 %1449 }
 0x774   : > { %v4204_v14 = vmul.f32 %v1471_v11, %v4024_v17  ;;  %v1472_v15 = vadd.f32 %v1450_v12, %v4065_v40  ;;  %v1452_v35 = vpop.permute.xlu1 %1451  ;;  %3246 = vrot.lane.b32.xlu1 %v3245_v29, %s3621_s22 }
 0x775   : > { %v1457_v18 = vsel %vm1453_vm13, %v1450_v12, %v1452_v35 }
 0x776   : > { %v1473_v19 = vadd.f32 %v1457_v18, %v4068_v41  ;;  %v3250_v36 = vpack.i.bf16 %v4204_v14, %v4201_v13  ;;  %v4213_v20 = vmul.f32 %v1472_v15, %v4022_v16 }
 0x778   : > { %v4216_v21 = vmul.f32 %v1473_v19, %v4024_v17  ;;  %3251 = vrot.lane.b32.xlu0 %v3250_v36, %s3621_s22 }
 0x77a   : > { %v3260_v40 = vpack.i.bf16 %v4216_v21, %v4213_v20 }
 0x77c   : > { %3256 = vrot.lane.b32.xlu0 %v3240_v23, %s3623_s18  ;;  %3261 = vrot.lane.b32.xlu1 %v3260_v40, %s3621_s22 }
 0x780   : > { %3271 = vrot.lane.b32.xlu0 %v3250_v36, %s3623_s18  ;;  %3266 = vrot.lane.b32.xlu1 %v3245_v29, %s3623_s18 }
 0x784   : > { %3281 = vrot.lane.b32.xlu0 %v3240_v23, %s3624_s14  ;;  %3276 = vrot.lane.b32.xlu1 %v3260_v40, %s3623_s18 }
 0x788   : > { %3291 = vrot.lane.b32.xlu0 %v3250_v36, %s3624_s14  ;;  %3286 = vrot.lane.b32.xlu1 %v3245_v29, %s3624_s14 }
 0x78c   : > { %3296 = vrot.lane.b32.xlu1 %v3260_v40, %s3624_s14 }
 0x7e2   : > { %v3242_v41 = vpop.permute.xlu0 %3241 }
 0x7e3   : > { %v3244_v22 = vunpack.i.h.bf16 %v3242_v41  ;;  %v3243_v24 = vunpack.i.l.bf16 %v3242_v41  ;;  %v2712_v41 = vld [vmem:[%s4564_s5 + $0x48] sm:$0xff] }
 0x7e5   : > { %v1506_v25 = vsel %vm1070_vm12, %v3243_v24, %v3244_v22 }
 0x7e6   : > { %v3300_v26 = vpack.i.bf16 %v3244_v22, %v1506_v25  ;;  %v3247_v27 = vpop.permute.xlu1 %3246  ;;  %v2713_v25 = vld [vmem:[%s4564_s5 + $0x50] sm:$0xff] }
 0x7e7   : > { %v3249_v44 = vunpack.i.h.bf16 %v3247_v27  ;;  %v3248_v28 = vunpack.i.l.bf16 %v3247_v27 }
 0x7e8   : > { %3301 = vrot.lane.b32.xlu0 %v3300_v26, %s3624_s14 }
 0x7e9   : > { %v1507_v31 = vsel %vm1070_vm12, %v3248_v28, %v3249_v44 }
 0x7ea   : > { %v3305_v32 = vpack.i.bf16 %v3249_v44, %v1507_v31  ;;  %v3252_v52 = vpop.permute.xlu0 %3251 }
 0x7eb   : > { %v3254_v33 = vunpack.i.h.bf16 %v3252_v52  ;;  %v3253_v53 = vunpack.i.l.bf16 %v3252_v52 }
 0x7ec   : > { %3306 = vrot.lane.b32.xlu1 %v3305_v32, %s3624_s14  ;;  %v2714_v32 = vld [vmem:[%s4564_s5 + $0x58] sm:$0xff] }
 0x7ed   : > { %v1508_v34 = vsel %vm1070_vm12, %v3253_v53, %v3254_v33  ;;  %v2724_v53 = vld [vmem:[%s4566_s7 + $0x48] sm:$0xff] }
 0x7ee   : > { %v3310_v37 = vpack.i.bf16 %v3254_v33, %v1508_v34  ;;  %v3262_v60 = vpop.permute.xlu1 %3261  ;;  %v3257_v38 = vpop.permute.xlu0 %3256  ;;  %v2723_v33 = vld [vmem:[%s4566_s7 + $0x40] sm:$0xff]  ;;  %v2725_v34 = vld [vmem:[%s4566_s7 + $0x50] sm:$0xff] }
 0x7ef   : > { %v3264_v39 = vunpack.i.h.bf16 %v3262_v60  ;;  %v3263_v63 = vunpack.i.l.bf16 %v3262_v60  ;;  %v3259_v6 = vunpack.i.h.bf16 %v3257_v38  ;;  %v3258_v7 = vunpack.i.l.bf16 %v3257_v38 }
 0x7f0   : > { %3311 = vrot.lane.b32.xlu0 %v3310_v37, %s3624_s14  ;;  %v2726_v37 = vld [vmem:[%s4566_s7 + $0x58] sm:$0xff] }
 0x7f1   : > { %v1509_v42 = vsel %vm1070_vm12, %v3263_v63, %v3264_v39  ;;  %v1527_v43 = vsel %vm1526_vm14, %v3258_v7, %v3259_v6 }
 0x7f2   : > { %v3320_v46 = vpack.i.bf16 %v3264_v39, %v1509_v42  ;;  %v3315_v47 = vpack.i.bf16 %v3259_v6, %v1527_v43  ;;  %v3267_v48 = vpop.permute.xlu1 %3266  ;;  %v3272_v49 = vpop.permute.xlu0 %3271 }
 0x7f3   : > { %v3269_v50 = vunpack.i.h.bf16 %v3267_v48  ;;  %v3268_v51 = vunpack.i.l.bf16 %v3267_v48  ;;  %v3274_v54 = vunpack.i.h.bf16 %v3272_v49  ;;  %v3273_v55 = vunpack.i.l.bf16 %v3272_v49 }
 0x7f4   : > { %3321 = vrot.lane.b32.xlu1 %v3320_v46, %s3624_s14  ;;  %3316 = vrot.lane.b32.xlu0 %v3315_v47, %s3624_s14 }
 0x7f5   : > { %v1528_v56 = vsel %vm1526_vm14, %v3268_v51, %v3269_v50  ;;  %v1529_v57 = vsel %vm1526_vm14, %v3273_v55, %v3274_v54 }
 0x7f6   : > { %v3325_v58 = vpack.i.bf16 %v3269_v50, %v1528_v56  ;;  %v3330_v59 = vpack.i.bf16 %v3274_v54, %v1529_v57  ;;  %v3277_v0 = vpop.permute.xlu1 %3276  ;;  %v3282_v1 = vpop.permute.xlu0 %3281 }
 0x7f7   : > { %v3279_v3 = vunpack.i.h.bf16 %v3277_v0  ;;  %v3278_v4 = vunpack.i.l.bf16 %v3277_v0  ;;  %v3284_v23 = vunpack.i.h.bf16 %v3282_v1  ;;  %v3283_v5 = vunpack.i.l.bf16 %v3282_v1 }
 0x7f8   : > { %3326 = vrot.lane.b32.xlu1 %v3325_v58, %s3624_s14  ;;  %3331 = vrot.lane.b32.xlu0 %v3330_v59, %s3624_s14 }
 0x7f9   : > { %v1530_v9 = vsel %vm1526_vm14, %v3278_v4, %v3279_v3  ;;  %v1610_v35 = vsel %vm1609_vm15, %v3283_v5, %v3284_v23 }
 0x7fa   : > { %v3335_v45 = vpack.i.bf16 %v3279_v3, %v1530_v9  ;;  %v3287_v11 = vpop.permute.xlu1 %3286  ;;  %v3292_v29 = vpop.permute.xlu0 %3291 }
 0x7fb   : > { %v3289_v12 = vunpack.i.h.bf16 %v3287_v11  ;;  %v3288_v15 = vunpack.i.l.bf16 %v3287_v11  ;;  %v3294_v36 = vunpack.i.h.bf16 %v3292_v29  ;;  %v3293_v40 = vunpack.i.l.bf16 %v3292_v29 }
 0x7fc   : > { %3336 = vrot.lane.b32.xlu1 %v3335_v45, %s3624_s14  ;;  %1543 = vperm.xlu0 %3098, %v2711_v10  }
 0x7fd   : > { %v1611_v18 = vsel %vm1609_vm15, %v3288_v15, %v3289_v12  ;;  %v2931_v19 = vpack.c.bf16 %v3289_v12, %v3284_v23  ;;  %v1612_v44 = vsel %vm1609_vm15, %v3293_v40, %v3294_v36 }
 0x7fe   : > { %v2933_v22 = vpack.c.bf16 %v1611_v18, %v1610_v35  ;;  %v3297_v24 = vpop.permute.xlu1 %3296 }
 0x7ff   : > { %v3299_v26 = vunpack.i.h.bf16 %v3297_v24  ;;  %v3298_v27 = vunpack.i.l.bf16 %v3297_v24  ;;  %2932 = vmatprep.subr.bf16.mxu0 %v2931_v19  ;;  %v2707_v24 = vld [vmem:[%s4563_s4 + $0x40] sm:$0xff] }
 0x800   : > { %1548 = vperm.xlu1 %3099, %v2712_v41   ;;  %2934 = vmatpush1.bf16.msra.mxu0 %v2933_v22 }
 0x801   : > { %v1613_v28 = vsel %vm1609_vm15, %v3298_v27, %v3299_v26  ;;  %v2935_v31 = vpack.c.bf16 %v3299_v26, %v3294_v36  ;;  %1553 = vperm.xlu0 %3098, %v2713_v25   ;;  %v2708_v25 = vld [vmem:[%s4563_s4 + $0x48] sm:$0xff]  ;;  %v2709_v26 = vld [vmem:[%s4563_s4 + $0x50] sm:$0xff]  ;;  %v2710_v27 = vld [vmem:[%s4563_s4 + $0x58] sm:$0xff] }
 0x802   : > { %v2937_v52 = vpack.c.bf16 %v1613_v28, %v1612_v44 }
 0x803   : > { %2936 = vmatprep.subr.bf16.mxu0 %v2935_v31 }
 0x804   : > { %1558 = vperm.xlu1 %3099, %v2714_v32   ;;  %2938 = vmatpush1.bf16.msra.mxu0 %v2937_v52 }
 0x805   : > { %1767 = vperm.xlu0 %3098, %v2723_v33  }
 0x808   : > { %1772 = vperm.xlu1 %3099, %v2724_v53  }
 0x809   : > { %1777 = vperm.xlu0 %3098, %v2725_v34  }
 0x80c   : > { %1782 = vperm.xlu1 %3099, %v2726_v37  }
 0x85a   : > { %v3302_v60 = vpop.permute.xlu0 %3301 }
 0x85b   : > { %v3304_v38 = vunpack.i.h.bf16 %v3302_v60  ;;  %v3303_v39 = vunpack.i.l.bf16 %v3302_v60 }
 0x85d   : > { %v1614_v42 = vsel %vm1609_vm15, %v3303_v39, %v3304_v38 }
 0x85e   : > { %v3307_v63 = vpop.permute.xlu1 %3306 }
 0x85f   : > { %v3309_v6 = vunpack.i.h.bf16 %v3307_v63  ;;  %v3308_v7 = vunpack.i.l.bf16 %v3307_v63 }
 0x861   : > { %v1615_v43 = vsel %vm1609_vm15, %v3308_v7, %v3309_v6  ;;  %v2939_v46 = vpack.c.bf16 %v3309_v6, %v3304_v38 }
 0x862   : > { %v2941_v47 = vpack.c.bf16 %v1615_v43, %v1614_v42  ;;  %v3312_v48 = vpop.permute.xlu0 %3311 }
 0x863   : > { %2940 = vmatprep.subr.bf16.mxu0 %v2939_v46  ;;  %v3314_v49 = vunpack.i.h.bf16 %v3312_v48  ;;  %v3313_v50 = vunpack.i.l.bf16 %v3312_v48 }
 0x864   : > { %2942 = vmatpush1.bf16.msra.mxu0 %v2941_v47 }
 0x865   : > { %v1616_v59 = vsel %vm1609_vm15, %v3313_v50, %v3314_v49 }
 0x866   : > { %v3322_v51 = vpop.permute.xlu1 %3321  ;;  %v3317_v54 = vpop.permute.xlu0 %3316 }
 0x867   : > { %v3324_v55 = vunpack.i.h.bf16 %v3322_v51  ;;  %v3323_v56 = vunpack.i.l.bf16 %v3322_v51  ;;  %v3319_v57 = vunpack.i.h.bf16 %v3317_v54  ;;  %v3318_v58 = vunpack.i.l.bf16 %v3317_v54 }
 0x869   : > { %v1617_v0 = vsel %vm1609_vm15, %v3323_v56, %v3324_v55  ;;  %v2943_v1 = vpack.c.bf16 %v3324_v55, %v3314_v49  ;;  %v1618_v10 = vsel %vm1609_vm15, %v3318_v58, %v3319_v57 }
 0x86a   : > { %v2945_v3 = vpack.c.bf16 %v1617_v0, %v1616_v59  ;;  %v3327_v4 = vpop.permute.xlu1 %3326  ;;  %v3332_v23 = vpop.permute.xlu0 %3331 }
 0x86b   : > { %v3329_v5 = vunpack.i.h.bf16 %v3327_v4  ;;  %v3328_v9 = vunpack.i.l.bf16 %v3327_v4  ;;  %2944 = vmatprep.subr.bf16.mxu0 %v2943_v1  ;;  %v3334_v29 = vunpack.i.h.bf16 %v3332_v23  ;;  %v3333_v12 = vunpack.i.l.bf16 %v3332_v23  ;;  %v2719_v4 = vld [vmem:[%s4565_s6 + $0x40] sm:$0xff]  ;;  %v2720_v23 = vld [vmem:[%s4565_s6 + $0x48] sm:$0xff] }
 0x86c   : > { %2946 = vmatpush1.bf16.msra.mxu0 %v2945_v3 }
 0x86d   : > { %v1619_v45 = vsel %vm1609_vm15, %v3328_v9, %v3329_v5  ;;  %v2947_v11 = vpack.c.bf16 %v3329_v5, %v3319_v57  ;;  %v1620_v36 = vsel %vm1609_vm15, %v3333_v12, %v3334_v29  ;;  %v2721_v5 = vld [vmem:[%s4565_s6 + $0x50] sm:$0xff]  ;;  %v2722_v9 = vld [vmem:[%s4565_s6 + $0x58] sm:$0xff] }
 0x86e   : > { %v2949_v15 = vpack.c.bf16 %v1619_v45, %v1618_v10  ;;  %v3337_v35 = vpop.permute.xlu1 %3336 }
 0x86f   : > { %v3339_v18 = vunpack.i.h.bf16 %v3337_v35  ;;  %v3338_v19 = vunpack.i.l.bf16 %v3337_v35  ;;  %2948 = vmatprep.subr.bf16.mxu0 %v2947_v11 }
 0x870   : > { %2950 = vmatpush1.bf16.msra.mxu0 %v2949_v15 }
 0x871   : > { %v1621_v40 = vsel %vm1609_vm15, %v3338_v19, %v3339_v18  ;;  %v2951_v41 = vpack.c.bf16 %v3339_v18, %v3334_v29 }
 0x872   : > { %v2953_v22 = vpack.c.bf16 %v1621_v40, %v1620_v36 }
 0x873   : > { %2952 = vmatprep.subr.bf16.mxu0 %v2951_v41 }
 0x874   : > { %2954 = vmatpush1.bf16.msra.mxu0 %v2953_v22 }
 0x877   : > { %2715 = vmatmul.mubr.msk.f32.vlgmr.msra.gmra.mrb[24].mxu0 %vm722_vm9, %v2707_v24 }
 0x878   : > { %1728 = vmatprep.mubr.f32.mxu0 %v3616_v2 }
 0x87b   : > { %2716 = vmatmul.mubr.msk.f32.gmra.mrb[26].mxu0 %vm722_vm9, %v2708_v25  ;;  %v1544_v31 = vpop.permute.xlu0 %1543 }
 0x87c   : > { %1734 = vmatprep.mubr.f32.mxu0 %v3616_v2 }
 0x87f   : > { %2717 = vmatmul.mubr.msk.f32.gmra.mrb[28].mxu0 %vm722_vm9, %v2709_v26  ;;  %v1549_v52 = vpop.permute.xlu1 %1548 }
 0x880   : > { %1740 = vmatprep.mubr.f32.mxu0 %v3616_v2  ;;  %v1554_v46 = vpop.permute.xlu0 %1553 }
 0x883   : > { %2718 = vmatmul.mubr.msk.f32.gmra.mrb[30].mxu0 %vm722_vm9, %v2710_v27  ;;  %v1559_v49 = vpop.permute.xlu1 %1558 }
 0x884   : > { %v1768_v10 = vpop.permute.xlu0 %1767 }
 0x887   : > { %v1773_v15 = vpop.permute.xlu1 %1772 }
 0x88b   : > { %v1783_v25 = vpop.permute.xlu1 %1782 }
 0x94a   : > { %v1724_v44 = vpop.f32.mrb[24].mxu0 }
 0x94b   : > { %v1726_v28 = vpop.f32.mrb[25].mxu0  ;;  %v1725_v32 = vadd.f32 %v1724_v44, %v1544_v31 }
 0x94c   : > { %v1727_v33 = vadd.f32 %v1726_v28, %v1544_v31 }
 0x94d   : > { %v1747_v38 = vmax.f32 %v1725_v32, 0.0 }
 0x94e   : > { %v1730_v53 = vpop.f32.mrb[26].mxu0  ;;  %v1748_v63 = vmax.f32 %v1727_v33, 0.0 }
 0x94f   : > { %v1731_v34 = vadd.f32 %v1730_v53, %v1549_v52  ;;  %v1732_v37 = vpop.f32.mrb[27].mxu0 }
 0x950   : > { %v1733_v60 = vadd.f32 %v1732_v37, %v1549_v52 }
 0x951   : > { %v1749_v39 = vmax.f32 %v1731_v34, 0.0 }
 0x952   : > { %v1750_v6 = vmax.f32 %v1733_v60, 0.0  ;;  %v1736_v7 = vpop.f32.mrb[28].mxu0 }
 0x953   : > { %v2957_v42 = vpack.c.bf16 %v1749_v39, %v1747_v38  ;;  %v1738_v43 = vpop.f32.mrb[29].mxu0  ;;  %v1737_v48 = vadd.f32 %v1736_v7, %v1554_v46 }
 0x954   : > { %v2955_v47 = vpack.c.bf16 %v1750_v6, %v1748_v63  ;;  %v1739_v50 = vadd.f32 %v1738_v43, %v1554_v46 }
 0x955   : > { %v1751_v57 = vmax.f32 %v1737_v48, 0.0 }
 0x956   : > { %v1742_v51 = vpop.f32.mrb[30].mxu0  ;;  %2956 = vmatprep.subr.bf16.mxu1 %v2955_v47  ;;  %v1752_v59 = vmax.f32 %v1739_v50, 0.0 }
 0x957   : > { %v1743_v54 = vadd.f32 %v1742_v51, %v1559_v49  ;;  %v1744_v55 = vpop.f32.mrb[31].mxu0  ;;  %2958 = vmatpush1.bf16.msra.mxu1 %v2957_v42 }
 0x958   : > { %v1745_v56 = vadd.f32 %v1744_v55, %v1559_v49 }
 0x959   : > { %v1753_v58 = vmax.f32 %v1743_v54, 0.0 }
 0x95a   : > { %v1754_v0 = vmax.f32 %v1745_v56, 0.0 }
 0x95b   : > { %v2961_v1 = vpack.c.bf16 %v1753_v58, %v1751_v57 }
 0x95c   : > { %v2959_v3 = vpack.c.bf16 %v1754_v0, %v1752_v59 }
 0x95e   : > { %2960 = vmatprep.subr.bf16.mxu1 %v2959_v3 }
 0x95f   : > { %2962 = vmatpush1.bf16.msra.mxu1 %v2961_v1 }
 0x962   : > { %2727 = vmatmul.mubr.msk.f32.vlgmr.msra.gmra.mrb[16].mxu1 %vm860_vm10, %v2719_v4 }
 0x963   : > { %1867 = vmatprep.mubr.f32.mxu1 %v3616_v2 }
 0x966   : > { %2728 = vmatmul.mubr.msk.f32.gmra.mrb[18].mxu1 %vm860_vm10, %v2720_v23 }
 0x967   : > { %1873 = vmatprep.mubr.f32.mxu1 %v3616_v2 }
 0x96a   : > { %2729 = vmatmul.mubr.msk.f32.gmra.mrb[20].mxu1 %vm860_vm10, %v2721_v5 }
 0x96b   : > { %1879 = vmatprep.mubr.f32.mxu1 %v3616_v2  ;;  %v1778_v2 = vpop.permute.xlu0 %1777 }
 0x96e   : > { %2730 = vmatmul.mubr.msk.f32.gmra.mrb[22].mxu1 %vm860_vm10, %v2722_v9 }
 0xa35   : > { %v1863_v45 = vpop.f32.mrb[16].mxu1 }
 0xa36   : > { %v1864_v11 = vadd.f32 %v1863_v45, %v1768_v10  ;;  %v1865_v29 = vpop.f32.mrb[17].mxu1 }
 0xa37   : > { %v1866_v12 = vadd.f32 %v1865_v29, %v1768_v10 }
 0xa38   : > { %1894 = vrot.lane.b32.xlu0 %v1864_v11, %s3625_s25 }
 0xa39   : > { %v1869_v35 = vpop.f32.mrb[18].mxu1  ;;  %1896 = vrot.lane.b32.xlu1 %v1866_v12, %s3625_s25 }
 0xa3a   : > { %v1870_v18 = vadd.f32 %v1869_v35, %v1773_v15  ;;  %v1871_v19 = vpop.f32.mrb[19].mxu1 }
 0xa3b   : > { %v1872_v36 = vadd.f32 %v1871_v19, %v1773_v15 }
 0xa3c   : > { %1898 = vrot.lane.b32.xlu0 %v1870_v18, %s3625_s25 }
 0xa3d   : > { %v1875_v40 = vpop.f32.mrb[20].mxu1  ;;  %1900 = vrot.lane.b32.xlu1 %v1872_v36, %s3625_s25 }
 0xa3e   : > { %v1876_v41 = vadd.f32 %v1875_v40, %v1778_v2  ;;  %v1877_v22 = vpop.f32.mrb[21].mxu1 }
 0xa3f   : > { %v1878_v24 = vadd.f32 %v1877_v22, %v1778_v2 }
 0xa40   : > { %1902 = vrot.lane.b32.xlu0 %v1876_v41, %s3625_s25 }
 0xa41   : > { %v1881_v26 = vpop.f32.mrb[22].mxu1  ;;  %1904 = vrot.lane.b32.xlu1 %v1878_v24, %s3625_s25 }
 0xa42   : > { %v1882_v27 = vadd.f32 %v1881_v26, %v1783_v25  ;;  %v1883_v44 = vpop.f32.mrb[23].mxu1 }
 0xa43   : > { %v1884_v28 = vadd.f32 %v1883_v44, %v1783_v25 }
 0xa44   : > { %1906 = vrot.lane.b32.xlu0 %v1882_v27, %s3625_s25 }
 0xa45   : > { %1908 = vrot.lane.b32.xlu1 %v1884_v28, %s3625_s25  ;;  %s3629_s25 = smov 113  }
 0xaaa   : > { %v1895_v31 = vpop.permute.xlu0 %1894 }
 0xaab   : > { %v1923_v32 = vadd.f32 %v1895_v31, %v4178_v61  ;;  %v1897_v52 = vpop.permute.xlu1 %1896 }
 0xaac   : > { %v1911_v33 = vsel %vm1910_vm0, %v1895_v31, %v1897_v52 }
 0xaad   : > { %v1924_v53 = vadd.f32 %v1911_v33, %v4181_v62  ;;  %v4324_v37 = vmul.f32 %v1923_v32, %v4022_v16  ;;  %v2731_v33 = vld [vmem:[%s4563_s4 + $0x60] sm:$0xff] }
 0xaae   : > { %v1899_v34 = vpop.permute.xlu0 %1898  ;;  %2824 = vmatprep.mubr.msk.f32.mxu1 %vm722_vm9, %v2731_v33 }
 0xaaf   : > { %v4327_v60 = vmul.f32 %v1924_v53, %v4024_v17  ;;  %v1925_v38 = vadd.f32 %v1899_v34, %v4189_v30  ;;  %v1901_v39 = vpop.permute.xlu1 %1900 }
 0xab0   : > { %v1912_v63 = vsel %vm1910_vm0, %v1899_v34, %v1901_v39 }
 0xab1   : > { %v1926_v6 = vadd.f32 %v1912_v63, %v4192_v8  ;;  %v3340_v61 = vpack.i.bf16 %v4327_v60, %v4324_v37  ;;  %v4335_v62 = vmul.f32 %v1925_v38, %v4022_v16 }
 0xab2   : > { %v1903_v7 = vpop.permute.xlu0 %1902 }
 0xab3   : > { %v4338_v42 = vmul.f32 %v1926_v6, %v4024_v17  ;;  %v1927_v43 = vadd.f32 %v1903_v7, %v4201_v13  ;;  %v1905_v46 = vpop.permute.xlu1 %1904  ;;  %3341 = vrot.lane.b32.xlu0 %v3340_v61, %s3623_s18 }
 0xab4   : > { %v1913_v30 = vsel %vm1910_vm0, %v1903_v7, %v1905_v46  ;;  %v2735_v46 = vld [vmem:[%s4564_s5 + $0x60] sm:$0xff] }
 0xab5   : > { %v1928_v47 = vadd.f32 %v1913_v30, %v4204_v14  ;;  %v3345_v8 = vpack.i.bf16 %v4338_v42, %v4335_v62  ;;  %v4347_v49 = vmul.f32 %v1927_v43, %v4022_v16 }
 0xab6   : > { %v1907_v48 = vpop.permute.xlu0 %1906 }
 0xab7   : > { %v4350_v50 = vmul.f32 %v1928_v47, %v4024_v17  ;;  %v1929_v51 = vadd.f32 %v1907_v48, %v4213_v20  ;;  %v1909_v13 = vpop.permute.xlu1 %1908  ;;  %3346 = vrot.lane.b32.xlu1 %v3345_v8, %s3623_s18 }
 0xab8   : > { %v1914_v54 = vsel %vm1910_vm0, %v1907_v48, %v1909_v13 }
 0xab9   : > { %v1930_v55 = vadd.f32 %v1914_v54, %v4216_v21  ;;  %v3350_v14 = vpack.i.bf16 %v4350_v50, %v4347_v49  ;;  %v4359_v56 = vmul.f32 %v1929_v51, %v4022_v16 }
 0xabb   : > { %v4362_v57 = vmul.f32 %v1930_v55, %v4024_v17  ;;  %3351 = vrot.lane.b32.xlu0 %v3350_v14, %s3623_s18  ;;  %v2736_v55 = vld [vmem:[%s4564_s5 + $0x68] sm:$0xff] }
 0xabd   : > { %v3360_v20 = vpack.i.bf16 %v4362_v57, %v4359_v56 }
 0xabf   : > { %3356 = vrot.lane.b32.xlu0 %v3340_v61, %s3626_s26  ;;  %3361 = vrot.lane.b32.xlu1 %v3360_v20, %s3623_s18 }
 0xac3   : > { %3371 = vrot.lane.b32.xlu0 %v3350_v14, %s3626_s26  ;;  %3366 = vrot.lane.b32.xlu1 %v3345_v8, %s3626_s26 }
 0xac7   : > { %3381 = vrot.lane.b32.xlu0 %v3340_v61, %s3627_s28  ;;  %3376 = vrot.lane.b32.xlu1 %v3360_v20, %s3626_s26 }
 0xacb   : > { %3391 = vrot.lane.b32.xlu0 %v3350_v14, %s3627_s28  ;;  %3386 = vrot.lane.b32.xlu1 %v3345_v8, %s3627_s28 }
 0xacf   : > { %3396 = vrot.lane.b32.xlu1 %v3360_v20, %s3627_s28 }
 0xb25   : > { %v3342_v21 = vpop.permute.xlu0 %3341 }
 0xb26   : > { %v3344_v58 = vunpack.i.h.bf16 %v3342_v21  ;;  %v3343_v59 = vunpack.i.l.bf16 %v3342_v21 }
 0xb28   : > { %v1963_v0 = vsel %vm1526_vm14, %v3343_v59, %v3344_v58  ;;  %v2737_v59 = vld [vmem:[%s4564_s5 + $0x70] sm:$0xff] }
 0xb29   : > { %v3400_v1 = vpack.i.bf16 %v3344_v58, %v1963_v0  ;;  %v3347_v3 = vpop.permute.xlu1 %3346 }
 0xb2a   : > { %v3349_v4 = vunpack.i.h.bf16 %v3347_v3  ;;  %v3348_v23 = vunpack.i.l.bf16 %v3347_v3  ;;  %v2738_v3 = vld [vmem:[%s4564_s5 + $0x78] sm:$0xff] }
 0xb2b   : > { %3401 = vrot.lane.b32.xlu0 %v3400_v1, %s3627_s28 }
 0xb2c   : > { %v1964_v5 = vsel %vm1526_vm14, %v3348_v23, %v3349_v4 }
 0xb2d   : > { %v3405_v9 = vpack.i.bf16 %v3349_v4, %v1964_v5  ;;  %v3352_v10 = vpop.permute.xlu0 %3351 }
 0xb2e   : > { %v3354_v45 = vunpack.i.h.bf16 %v3352_v10  ;;  %v3353_v11 = vunpack.i.l.bf16 %v3352_v10  ;;  %v2748_v10 = vld [vmem:[%s4566_s7 + $0x68] sm:$0xff] }
 0xb2f   : > { %3406 = vrot.lane.b32.xlu1 %v3405_v9, %s3627_s28  ;;  %v2747_v9 = vld [vmem:[%s4566_s7 + $0x60] sm:$0xff] }
 0xb30   : > { %v1965_v29 = vsel %vm1526_vm14, %v3353_v11, %v3354_v45  ;;  %v2750_v11 = vld [vmem:[%s4566_s7 + $0x78] sm:$0xff] }
 0xb31   : > { %v3410_v12 = vpack.i.bf16 %v3354_v45, %v1965_v29  ;;  %v3362_v15 = vpop.permute.xlu1 %3361  ;;  %v3357_v35 = vpop.permute.xlu0 %3356  ;;  %v2749_v45 = vld [vmem:[%s4566_s7 + $0x70] sm:$0xff] }
 0xb32   : > { %v3364_v18 = vunpack.i.h.bf16 %v3362_v15  ;;  %v3363_v19 = vunpack.i.l.bf16 %v3362_v15  ;;  %v3359_v36 = vunpack.i.h.bf16 %v3357_v35  ;;  %v3358_v2 = vunpack.i.l.bf16 %v3357_v35 }
 0xb33   : > { %3411 = vrot.lane.b32.xlu0 %v3410_v12, %s3627_s28 }
 0xb34   : > { %v1966_v40 = vsel %vm1526_vm14, %v3363_v19, %v3364_v18  ;;  %v1984_v41 = vsel %vm1983_vm1, %v3358_v2, %v3359_v36 }
 0xb35   : > { %v3420_v22 = vpack.i.bf16 %v3364_v18, %v1966_v40  ;;  %v3415_v24 = vpack.i.bf16 %v3359_v36, %v1984_v41  ;;  %v3367_v25 = vpop.permute.xlu1 %3366  ;;  %v3372_v26 = vpop.permute.xlu0 %3371 }
 0xb36   : > { %v3369_v27 = vunpack.i.h.bf16 %v3367_v25  ;;  %v3368_v44 = vunpack.i.l.bf16 %v3367_v25  ;;  %v3374_v28 = vunpack.i.h.bf16 %v3372_v26  ;;  %v3373_v31 = vunpack.i.l.bf16 %v3372_v26 }
 0xb37   : > { %3421 = vrot.lane.b32.xlu1 %v3420_v22, %s3627_s28  ;;  %3416 = vrot.lane.b32.xlu0 %v3415_v24, %s3627_s28 }
 0xb38   : > { %v1985_v32 = vsel %vm1983_vm1, %v3368_v44, %v3369_v27  ;;  %v1986_v52 = vsel %vm1983_vm1, %v3373_v31, %v3374_v28 }
 0xb39   : > { %v3425_v53 = vpack.i.bf16 %v3369_v27, %v1985_v32  ;;  %v3430_v34 = vpack.i.bf16 %v3374_v28, %v1986_v52  ;;  %v3377_v38 = vpop.permute.xlu1 %3376  ;;  %v3382_v39 = vpop.permute.xlu0 %3381 }
 0xb3a   : > { %v3379_v63 = vunpack.i.h.bf16 %v3377_v38  ;;  %v3378_v6 = vunpack.i.l.bf16 %v3377_v38  ;;  %v3384_v7 = vunpack.i.h.bf16 %v3382_v39  ;;  %v3383_v43 = vunpack.i.l.bf16 %v3382_v39 }
 0xb3b   : > { %3426 = vrot.lane.b32.xlu1 %v3425_v53, %s3627_s28  ;;  %3431 = vrot.lane.b32.xlu0 %v3430_v34, %s3627_s28 }
 0xb3c   : > { %v1987_v61 = vsel %vm1983_vm1, %v3378_v6, %v3379_v63  ;;  %v2067_v14 = vsel %vm2066_vm2, %v3383_v43, %v3384_v7 }
 0xb3d   : > { %v3435_v30 = vpack.i.bf16 %v3379_v63, %v1987_v61  ;;  %v3387_v47 = vpop.permute.xlu1 %3386  ;;  %v3392_v8 = vpop.permute.xlu0 %3391 }
 0xb3e   : > { %v3389_v48 = vunpack.i.h.bf16 %v3387_v47  ;;  %v3388_v51 = vunpack.i.l.bf16 %v3387_v47  ;;  %v3394_v13 = vunpack.i.h.bf16 %v3392_v8  ;;  %v3393_v54 = vunpack.i.l.bf16 %v3392_v8 }
 0xb3f   : > { %3436 = vrot.lane.b32.xlu1 %v3435_v30, %s3627_s28  ;;  %2000 = vperm.xlu0 %3098, %v2735_v46  }
 0xb40   : > { %v2068_v20 = vsel %vm2066_vm2, %v3388_v51, %v3389_v48  ;;  %v2069_v4 = vsel %vm2066_vm2, %v3393_v54, %v3394_v13  ;;  %v2732_v13 = vld [vmem:[%s4563_s4 + $0x68] sm:$0xff]  ;;  %v2733_v54 = vld [vmem:[%s4563_s4 + $0x70] sm:$0xff] }
 0xb41   : > { %v3397_v21 = vpop.permute.xlu1 %3396  ;;  %v2963_v58 = vpack.c.bf16 %v2068_v20, %v2067_v14  ;;  %v2743_v14 = vld [vmem:[%s4565_s6 + $0x60] sm:$0xff] }
 0xb42   : > { %v3399_v0 = vunpack.i.h.bf16 %v3397_v21  ;;  %v3398_v1 = vunpack.i.l.bf16 %v3397_v21  ;;  %2838 = vmatprep.mubr.msk.f32.mxu0 %vm860_vm10, %v2743_v14 }
 0xb43   : > { %2005 = vperm.xlu1 %3099, %v2736_v55   ;;  %2964 = vmatprep.subr.bf16.mxu1 %v2963_v58  ;;  %v2734_v55 = vld [vmem:[%s4563_s4 + $0x78] sm:$0xff] }
 0xb44   : > { %2010 = vperm.xlu0 %3098, %v2737_v59   ;;  %2966 = vmatpush3.bf16.msra.mxu1 %v2963_v58  ;;  %v2070_v23 = vsel %vm2066_vm2, %v3398_v1, %v3399_v0 }
 0xb45   : > { %v2967_v5 = vpack.c.bf16 %v2070_v23, %v2069_v4 }
 0xb47   : > { %2015 = vperm.xlu1 %3099, %v2738_v3   ;;  %2968 = vmatprep.subr.bf16.mxu1 %v2967_v5 }
 0xb48   : > { %2204 = vperm.xlu0 %3098, %v2747_v9   ;;  %2970 = vmatpush3.bf16.msra.mxu1 %v2967_v5 }
 0xb4b   : > { %2209 = vperm.xlu1 %3099, %v2748_v10  }
 0xb4c   : > { %2214 = vperm.xlu0 %3098, %v2749_v45  }
 0xb4f   : > { %2219 = vperm.xlu1 %3099, %v2750_v11  }
 0xb9d   : > { %v3402_v29 = vpop.permute.xlu0 %3401 }
 0xb9e   : > { %v3404_v12 = vunpack.i.h.bf16 %v3402_v29  ;;  %v3403_v15 = vunpack.i.l.bf16 %v3402_v29 }
 0xba0   : > { %v2071_v36 = vsel %vm2066_vm2, %v3403_v15, %v3404_v12 }
 0xba1   : > { %v3407_v35 = vpop.permute.xlu1 %3406 }
 0xba2   : > { %v3409_v18 = vunpack.i.h.bf16 %v3407_v35  ;;  %v3408_v19 = vunpack.i.l.bf16 %v3407_v35 }
 0xba4   : > { %v2072_v2 = vsel %vm2066_vm2, %v3408_v19, %v3409_v18  ;;  %v2744_v18 = vld [vmem:[%s4565_s6 + $0x68] sm:$0xff]  ;;  %v2745_v19 = vld [vmem:[%s4565_s6 + $0x70] sm:$0xff] }
 0xba5   : > { %v3412_v40 = vpop.permute.xlu0 %3411  ;;  %v2971_v41 = vpack.c.bf16 %v2072_v2, %v2071_v36  ;;  %v2746_v36 = vld [vmem:[%s4565_s6 + $0x78] sm:$0xff] }
 0xba6   : > { %v3414_v22 = vunpack.i.h.bf16 %v3412_v40  ;;  %v3413_v24 = vunpack.i.l.bf16 %v3412_v40 }
 0xba7   : > { %2972 = vmatprep.subr.bf16.mxu1 %v2971_v41 }
 0xba8   : > { %2974 = vmatpush3.bf16.msra.mxu1 %v2971_v41  ;;  %v2073_v32 = vsel %vm2066_vm2, %v3413_v24, %v3414_v22 }
 0xba9   : > { %v3422_v25 = vpop.permute.xlu1 %3421  ;;  %v3417_v26 = vpop.permute.xlu0 %3416 }
 0xbaa   : > { %v3424_v27 = vunpack.i.h.bf16 %v3422_v25  ;;  %v3423_v44 = vunpack.i.l.bf16 %v3422_v25  ;;  %v3419_v28 = vunpack.i.h.bf16 %v3417_v26  ;;  %v3418_v31 = vunpack.i.l.bf16 %v3417_v26 }
 0xbac   : > { %v2074_v52 = vsel %vm2066_vm2, %v3423_v44, %v3424_v27  ;;  %v2075_v61 = vsel %vm2066_vm2, %v3418_v31, %v3419_v28 }
 0xbad   : > { %v3427_v33 = vpop.permute.xlu1 %3426  ;;  %v3432_v53 = vpop.permute.xlu0 %3431  ;;  %v2975_v34 = vpack.c.bf16 %v2074_v52, %v2073_v32 }
 0xbae   : > { %v3429_v38 = vunpack.i.h.bf16 %v3427_v33  ;;  %v3428_v39 = vunpack.i.l.bf16 %v3427_v33  ;;  %v3434_v63 = vunpack.i.h.bf16 %v3432_v53  ;;  %v3433_v6 = vunpack.i.l.bf16 %v3432_v53 }
 0xbaf   : > { %2976 = vmatprep.subr.bf16.mxu1 %v2975_v34 }
 0xbb0   : > { %2978 = vmatpush3.bf16.msra.mxu1 %v2975_v34  ;;  %v2076_v7 = vsel %vm2066_vm2, %v3428_v39, %v3429_v38  ;;  %v2077_v8 = vsel %vm2066_vm2, %v3433_v6, %v3434_v63 }
 0xbb1   : > { %v3437_v43 = vpop.permute.xlu1 %3436  ;;  %v2979_v46 = vpack.c.bf16 %v2076_v7, %v2075_v61 }
 0xbb2   : > { %v3439_v30 = vunpack.i.h.bf16 %v3437_v43  ;;  %v3438_v47 = vunpack.i.l.bf16 %v3437_v43 }
 0xbb3   : > { %2980 = vmatprep.subr.bf16.mxu1 %v2979_v46 }
 0xbb4   : > { %2982 = vmatpush3.bf16.msra.mxu1 %v2979_v46  ;;  %v2078_v48 = vsel %vm2066_vm2, %v3438_v47, %v3439_v30 }
 0xbb5   : > { %v2983_v51 = vpack.c.bf16 %v2078_v48, %v2077_v8 }
 0xbb7   : > { %2984 = vmatprep.subr.bf16.mxu1 %v2983_v51 }
 0xbb8   : > { %2986 = vmatpush3.bf16.msra.mxu1 %v2983_v51 }
 0xbbb   : > { %2825 = vmatmul.mubr.msk.f32.vlgmr.msra.gmra.mrb[24].mxu1 %vm722_vm9, %v2732_v13 }
 0xbbc   : > { %2827 = vmatprep.mubr.msk.f32.mxu1 %vm722_vm9, %v2733_v54 }
 0xbbe   : > { %v2001_v21 = vpop.permute.xlu0 %2000 }
 0xbbf   : > { %2828 = vmatmul.mubr.msk.f32.gmra.mrb[26].mxu1 %vm722_vm9, %v2734_v55 }
 0xbc2   : > { %v2006_v20 = vpop.permute.xlu1 %2005 }
 0xbc3   : > { %v2011_v9 = vpop.permute.xlu0 %2010 }
 0xbc6   : > { %v2016_v4 = vpop.permute.xlu1 %2015 }
 0xbc7   : > { %v2205_v40 = vpop.permute.xlu0 %2204 }
 0xbca   : > { %v2210_v2 = vpop.permute.xlu1 %2209 }
 0xbcb   : > { %v2215_v44 = vpop.permute.xlu0 %2214 }
 0xbce   : > { %v2220_v26 = vpop.permute.xlu1 %2219 }
 0xc8e   : > { %v2826_v58 = vpop.f32.mrb[24].mxu1 }
 0xc8f   : > { %v2175_v59 = vadd.f32 %v2826_v58, %v2006_v20  ;;  %v2169_v0 = vpop.f32.mrb[25].mxu1 }
 0xc90   : > { %v2170_v1 = vadd.f32 %v2169_v0, %v2001_v21 }
 0xc91   : > { %v2189_v3 = vmax.f32 %v2175_v59, 0.0 }
 0xc92   : > { %v2188_v23 = vmax.f32 %v2170_v1, 0.0  ;;  %v2829_v5 = vpop.f32.mrb[26].mxu1 }
 0xc93   : > { %v2185_v10 = vadd.f32 %v2829_v5, %v2016_v4  ;;  %v2179_v45 = vpop.f32.mrb[27].mxu1 }
 0xc94   : > { %v2987_v11 = vpack.c.bf16 %v2189_v3, %v2188_v23  ;;  %v2180_v29 = vadd.f32 %v2179_v45, %v2011_v9 }
 0xc95   : > { %v2191_v12 = vmax.f32 %v2185_v10, 0.0 }
 0xc96   : > { %v2190_v15 = vmax.f32 %v2180_v29, 0.0  ;;  %2988 = vmatprep.subr.bf16.mxu0 %v2987_v11  ;;  %v2352_v29 = vld [vmem:[%s4567_s8 + $0x8] sm:$0xff] }
 0xc97   : > { %2990 = vmatpush3.bf16.msra.mxu0 %v2987_v11 }
 0xc98   : > { %v2991_v35 = vpack.c.bf16 %v2191_v12, %v2190_v15 }
 0xc9a   : > { %2992 = vmatprep.subr.bf16.mxu0 %v2991_v35 }
 0xc9b   : > { %2994 = vmatpush3.bf16.msra.mxu0 %v2991_v35 }
 0xc9e   : > { %2839 = vmatmul.mubr.msk.f32.vlgmr.msra.gmra.mrb[32].mxu0 %vm860_vm10, %v2744_v18 }
 0xc9f   : > { %2841 = vmatprep.mubr.msk.f32.mxu0 %vm860_vm10, %v2745_v19 }
 0xca2   : > { %2842 = vmatmul.mubr.msk.f32.gmra.mrb[34].mxu0 %vm860_vm10, %v2746_v36 }
 0xd71   : > { %v2840_v41 = vpop.f32.mrb[32].mxu0 }
 0xd72   : > { %v2306_v22 = vadd.f32 %v2840_v41, %v2210_v2  ;;  %v2300_v24 = vpop.f32.mrb[33].mxu0 }
 0xd73   : > { %v2301_v25 = vadd.f32 %v2300_v24, %v2205_v40 }
 0xd74   : > { %2325 = vrot.lane.b32.xlu1 %v2306_v22, %s3628_s10 }
 0xd75   : > { %v2843_v27 = vpop.f32.mrb[34].mxu0  ;;  %2323 = vrot.lane.b32.xlu0 %v2301_v25, %s3628_s10 }
 0xd76   : > { %v2316_v28 = vadd.f32 %v2843_v27, %v2220_v26  ;;  %v2310_v31 = vpop.f32.mrb[35].mxu0 }
 0xd77   : > { %v2311_v32 = vadd.f32 %v2310_v31, %v2215_v44 }
 0xd78   : > { %2329 = vrot.lane.b32.xlu1 %v2316_v28, %s3628_s10 }
 0xd79   : > { %2327 = vrot.lane.b32.xlu0 %v2311_v32, %s3628_s10  ;;  %s4604_s10 = smov %s4603_s17 }
 0xde6   : > { %v2326_v52 = vpop.permute.xlu1 %2325 }
 0xde7   : > { %v2337_v33 = vadd.f32 %v2326_v52, %v4335_v62  ;;  %v2338_v53 = vadd.f32 %v2326_v52, %v4338_v42  ;;  %v2324_v34 = vpop.permute.xlu0 %2323 }
 0xde8   : > { %v2335_v38 = vadd.f32 %v2324_v34, %v4324_v37  ;;  %v2336_v39 = vadd.f32 %v2324_v34, %v4327_v60  ;;  %v2351_v37 = vld [vmem:[%s4567_s8] sm:$0xff] }
 0xde9   : > { %v2345_v63 = vmul.f32 %v2337_v33, %v4022_v16  ;;  %v2346_v6 = vmul.f32 %v2338_v53, %v4024_v17  ;;  %2852 = vmatprep.mubr.msk.f32.mxu0 %vm860_vm10, %v2351_v37 }
 0xdea   : > { %v2343_v61 = vmul.f32 %v2335_v38, %v4022_v16  ;;  %v2344_v7 = vmul.f32 %v2336_v39, %v4024_v17  ;;  %v2330_v43 = vpop.permute.xlu1 %2329 }
 0xdeb   : > { %v3440_v46 = vpack.i.bf16 %v2346_v6, %v2345_v63  ;;  %v2341_v30 = vadd.f32 %v2330_v43, %v4359_v56  ;;  %v2342_v62 = vadd.f32 %v2330_v43, %v4362_v57  ;;  %v2328_v42 = vpop.permute.xlu0 %2327 }
 0xdec   : > { %v3445_v60 = vpack.i.bf16 %v2344_v7, %v2343_v61  ;;  %v2339_v47 = vadd.f32 %v2328_v42, %v4347_v49  ;;  %v2340_v8 = vadd.f32 %v2328_v42, %v4350_v50  ;;  %v2354_v49 = vld [vmem:[%s4568_s9 + $0x8] sm:$0xff]  ;;  %v2353_v50 = vld [vmem:[%s4568_s9] sm:$0xff] }
 0xded   : > { %v2349_v48 = vmul.f32 %v2341_v30, %v4022_v16  ;;  %v2350_v51 = vmul.f32 %v2342_v62, %v4024_v17  ;;  %3441 = vrot.lane.b32.xlu1 %v3440_v46, %s3629_s25 }
 0xdee   : > { %v2347_v56 = vmul.f32 %v2339_v47, %v4022_v16  ;;  %v2348_v57 = vmul.f32 %v2340_v8, %v4024_v17  ;;  %3446 = vrot.lane.b32.xlu0 %v3445_v60, %s3629_s25 }
 0xdef   : > { %v3455_v13 = vpack.i.bf16 %v2350_v51, %v2349_v48 }
 0xdf0   : > { %v3450_v54 = vpack.i.bf16 %v2348_v57, %v2347_v56 }
 0xdf1   : > { %3456 = vrot.lane.b32.xlu1 %v3455_v13, %s3629_s25 }
 0xdf2   : > { %3451 = vrot.lane.b32.xlu0 %v3450_v54, %s3629_s25 }
 0xdf5   : > { %2362 = vperm.xlu1 %3099, %v2354_v49  }
 0xdf6   : > { %2357 = vperm.xlu0 %3098, %v2353_v50  }
 0xdf9   : > { %2481 = vrot.lane.b32.xlu1 %v4024_v17, %s3629_s25 }
 0xdfa   : > { %2479 = vrot.lane.b32.xlu0 %v4022_v16, %s3629_s25  ;;  %s3630_s25 = smov [#allocation5]  }
 0xdfb   : > { %s3512_s26 = sshll.u32 %s3630_s25, 4  ;;  %s3513_s26 = int_to_ptr.vmem [resolvable:$false] %s3512_s26 }
 0xdfc   : > { %s3514_s28 = scalar_lea.vmem %s3513_s26, 512  ;;  %p3515_p4 = scmp.lt.s32.totalorder %s4501_s15, %s3513_s26 }
 0xdfd   : > { %p3516_p5 = scmp.lt.s32.totalorder %s3514_s28, %s3508_s30 }
 0xdff   : > { %p3517_p6 = por %p3516_p5, %p3515_p4 }
 0xe01   : > { %p3518_p7 = pnand %p3517_p6, %p3511_p2 }
 0xe5f   : > { %v3442_v55 = vpop.permute.xlu1 %3441 }
 0xe60   : > { %v3444_v14 = vunpack.i.h.bf16 %v3442_v55  ;;  %v3443_v20 = vunpack.i.l.bf16 %v3442_v55  ;;  %v3447_v21 = vpop.permute.xlu0 %3446 }
 0xe61   : > { %v3449_v58 = vunpack.i.h.bf16 %v3447_v21  ;;  %v3448_v59 = vunpack.i.l.bf16 %v3447_v21 }
 0xe62   : > { %v2391_v0 = vsel %vm2389_vm3, %v3443_v20, %v3444_v14 }
 0xe63   : > { %v3457_v1 = vpop.permute.xlu1 %3456  ;;  %v2390_v3 = vsel %vm2389_vm3, %v3448_v59, %v3449_v58 }
 0xe64   : > { %v3459_v4 = vunpack.i.h.bf16 %v3457_v1  ;;  %v3458_v23 = vunpack.i.l.bf16 %v3457_v1  ;;  %v3452_v5 = vpop.permute.xlu0 %3451  ;;  %v2995_v17 = vpack.c.bf16 %v2391_v0, %v2390_v3 }
 0xe65   : > { %v3454_v9 = vunpack.i.h.bf16 %v3452_v5  ;;  %v3453_v16 = vunpack.i.l.bf16 %v3452_v5 }
 0xe66   : > { %2996 = vmatprep.subr.bf16.mxu0 %v2995_v17  ;;  %v2393_v10 = vsel %vm2389_vm3, %v3458_v23, %v3459_v4 }
 0xe67   : > { %2998 = vmatpush3.bf16.msra.mxu0 %v2995_v17  ;;  %v2392_v45 = vsel %vm2389_vm3, %v3453_v16, %v3454_v9 }
 0xe68   : > { %v2999_v11 = vpack.c.bf16 %v2393_v10, %v2392_v45 }
 0xe6a   : > { %3000 = vmatprep.subr.bf16.mxu0 %v2999_v11 }
 0xe6b   : > { %3002 = vmatpush3.bf16.msra.mxu0 %v2999_v11 }
 0xe6e   : > { %2853 = vmatmul.mubr.msk.f32.vlgmr.msra.gmra.mrb[36].mxu0 %vm860_vm10, %v2352_v29 }
 0xe74   : > { %v2363_v12 = vpop.permute.xlu1 %2362 }
 0xe75   : > { %v2358_v15 = vpop.permute.xlu0 %2357 }
 0xe78   : > { %v2482_v35 = vpop.permute.xlu1 %2481 }
 0xe79   : > { %v2480_v18 = vpop.permute.xlu0 %2479 }
 0xe7a   : > { %v2483_v36 = vsel %vm2389_vm3, %v2480_v18, %v2482_v35 }
 0xf41   : > { %v2854_v19 = vpop.f32.mrb[36].mxu0 }
 0xf42   : > { %v2476_v2 = vadd.f32 %v2854_v19, %v2363_v12  ;;  %v2470_v40 = vpop.f32.mrb[37].mxu0 }
 0xf43   : > { %v2471_v41 = vadd.f32 %v2470_v40, %v2358_v15 }
 0xf44   : > { %v2486_v22 = vmul.f32 %v2483_v36, %v2476_v2 }
 0xf45   : > { %v2485_v24 = vmul.f32 %v2483_v36, %v2471_v41 }
 0xf46   : > { %2488 = vst [vmem:[%s3766_s23 + $0x8] sm:$0xff] %v2486_v22 }
 0xf47   : > { %2487 = vst [vmem:[%s3766_s23] sm:$0xff] %v2485_v24 }
 0xf48   : > { %3521 = shalt.err (!%p3518_p7)
}
 0xf49   : > { %s3522_s23 = scalar_lea.hbm %s4499_s20, 256  ;;  %s3526_s22 = scalar_lea.hbm %s4604_s10, 1536 }
 0xf4a   : > { %p3523_p9 = scmp.ne.s32.totalorder %s4499_s20, %s3522_s23  ;;  %p3527_p12 = scmp.lt.u32.totalorder %s4499_s20, %s4604_s10 }
 0xf4b   : > { %p3528_p13 = scmp.lt.u32.totalorder %s3526_s22, %s3522_s23  ;;  %p3530_p1 = scmp.lt.u32.totalorder %s3522_s23, %s4499_s20 }
 0xf4c   : > { %p3524_p10 = pnand %p3523_p9, %p3740_p3 }
 0xf4d   : > { %p3529_p0 = por %p3528_p13, %p3527_p12 }
 0xf4e   : > { %p3525_p11 = pneg %p3524_p10 }
 0xf4f   : > { %p3531_p2 = por %p3530_p1, %p3529_p0 }
 0xf51   : > { %p3532_p4 = pnand %p3531_p2, %p3525_p11 }
 0xf53   : > { %3535 = shalt.err (!%p3532_p4)
}
 0xf54   : > { %s3631_s24 = smov 128   ;;  %s3632_s19 = smov 384  }
 0xf55   : > { %s3633_s11 = smov 8  }
 0xf56   : > { %3004 = dma.vmem_to_hbm [thread:$0]  (%p3740_p3), %s4501_s15, 256, %s4499_s20, %s4507_s12, %s3631_s24, %s3632_s19, %s3633_s11  }
 0xf57 PF: > { %s4606_s0 = sld [smem:[#allocation19_spill]]  ;;  %s4607_s29 = sld [smem:[#allocation14_spill]] }
 0xf5d   : > { %p3010_p5 = scmp.ge.s32.totalorder %s4606_s0, 2  ;;  %s2519_s16 = sand.u32 1, %s4607_s29  }
 0xf5e   : > { %s2520_s30 = scalar_lea.sflag [#allocation6], %s2519_s16 }
 0xf5f   : > { %p3007_p6 = pnand %p3010_p5, %p3749_p8 }
 0xf61   : > { %3573 = dma.done.wait (!%p3007_p6), %s2520_s30, 256  }
 0xf62   : > { %3575 = vsyncadd (!%p3007_p6), %s2520_s30, 4294967040  ;;  %s23_s20 = sadd.s32 1, %s4606_s0   ;;  %s4609_s13 = sld [smem:[#allocation15_spill]] }
 0xf63   : > { %p20_p7 = scmp.ge.s32.totalorder %s23_s20, 8   ;;  %s4610_s14 = sld [smem:[#allocation16_spill]] }
 0xf64   : > { %s4611_s15 = sld [smem:[#allocation24_spill]]  ;;  %s4612_s16 = sld [smem:[#allocation17_spill]] }
 0xf65   : > { %s4613_s17 = sld [smem:[#allocation18_spill]]  ;;  %s4614_s18 = sld [smem:[#allocation20_spill]] }
 0xf66   : > { %s4615_s19 = sld [smem:[#allocation22_spill]]  ;;  %22 = sbr.rel (!%p20_p7) target bundleno = 8 (0x8), region = 203 }
 0xf6d   :  { %2525 = vsyncpa [#allocation6], 1 }
 0xf6e   :  { %2527 = vsyncpa [#allocation6 + $0x1], 1 }
 0xf6f   :  { %2528 = vsyncmov [#allocation4] }
 0xf72   :  { %s2529_s12 = vpop.sfrf %2528 }
 0xf73   :  { %p2761_p3 = scmp.ne.s32.totalorder %s2529_s12, 0 }
 0xf75   :  { %2533 = shalt.err (%p2761_p3)  }
 0xf76   :  { %2535 = vsyncmov [#allocation4 + $0x1] }
 0xf79   :  { %s2536_s25 = vpop.sfrf %2535 }
 0xf7a   :  { %p2762_p8 = scmp.ne.s32.totalorder %s2536_s25, 0 }
 0xf7c   :  { %2540 = shalt.err (%p2762_p8)  }
 0xf7d   :  { %2542 = vsyncmov [#allocation4 + $0x2] }
 0xf80   :  { %s2543_s26 = vpop.sfrf %2542 }
 0xf81   :  { %p2763_p9 = scmp.ne.s32.totalorder %s2543_s26, 0 }
 0xf83   :  { %2547 = shalt.err (%p2763_p9)  }
 0xf84   :  { %2549 = vsyncmov [#allocation4 + $0x3] }
 0xf87   :  { %s2550_s28 = vpop.sfrf %2549 }
 0xf88   :  { %p2764_p10 = scmp.ne.s32.totalorder %s2550_s28, 0 }
 0xf8a   :  { %2554 = shalt.err (%p2764_p10)  }

</bundles_post_ra>
